<compile_context>
chip_gen: v5e
topology: v5e:2x2
jax: 0.10.0
libtpu: 0.0.40
codegen_flags: <defaults>
</compile_context>

<pallas_src>
import jax
import jax.numpy as jnp
from jax.experimental import pallas as pl
from jax.experimental.pallas import tpu as pltpu


def _round_up(x, m):
    return ((x + m - 1) // m) * m


def _cdiv(a, b):
    return -(-a // b)


def _tpu_generation():
    """Returns (is_v7x_like, vmem_cap_bytes). Conservative; never raises."""
    kind = ""
    try:
        kind = jax.devices()[0].device_kind.lower()
    except Exception:
        pass
    is_v7 = "v7" in kind
    cap = (48 if is_v7 else 100) * 1024 * 1024
    return is_v7, cap


def _value_kernel(x_ref, w1_ref, b1_ref, w2_ref, b2_ref, w3_ref, b3_ref,
                  out_ref):
    x = x_ref[...]                                                   # (tm, D)

    h = jnp.dot(x, w1_ref[...], preferred_element_type=jnp.float32) + b1_ref[...]
    h = jnp.maximum(h, 0.0)
    h = jnp.dot(h, w2_ref[...], preferred_element_type=jnp.float32) + b2_ref[...]
    h = jnp.maximum(h, 0.0)

    # Layer 3 (H -> 1) on VPU/XLU: elementwise mul with the (1, H) weight row
    # + lane reduction.  Keeps the MXU free and yields a lane-major row so the
    # (1, 1, tm) output store is lane-dense (no masked vst).
    v = jnp.sum(h * w3_ref[...], axis=-1)                            # (tm,)
    out_ref[...] = (v[None, :] + b3_ref[...])[None, :, :]            # (1, 1, tm)


def value_forward(state, params, *, tm=None):
    """state: (B, state_dim) -> (B,) value estimates."""
    x = state.astype(jnp.float32)
    B, D = x.shape
    w1, b1, w2, b2, w3, b3 = params
    H = w1.shape[1]

    w1 = w1.astype(jnp.float32)
    w2 = w2.astype(jnp.float32)
    b1 = jnp.reshape(b1.astype(jnp.float32), (1, H))
    b2 = jnp.reshape(b2.astype(jnp.float32), (1, H))
    w3r = jnp.reshape(w3.astype(jnp.float32), (1, H))   # row form for VPU layer 3
    b3r = jnp.reshape(b3.astype(jnp.float32), (1, 1))

    is_v7x, vmem_cap = _tpu_generation()

    # --- VMEM accounting with lane/sublane-padded shapes ---------------------
    Dp = _round_up(D, 128)            # x tile lane padding
    Hp = _round_up(H, 128)            # activation / weight lane padding
    param_pad_bytes = 4 * (
        _round_up(D, 8) * Hp + 8 * Hp        # w1, b1
        + _round_up(H, 8) * Hp + 8 * Hp      # w2, b2
        + 8 * Hp + 8 * 128                   # w3 row, b3
    )
    per_row_bytes = 4 * (2 * Dp       # double-buffered input tile
                         + 2 * 8      # double-buffered output block (8-sublane pad)
                         + 2 * Hp)    # live f32 activations
    slack = 2 * 1024 * 1024
    tm_cap = max(8, ((vmem_cap - 2 * param_pad_bytes - slack)
                     // per_row_bytes) // 8 * 8)

    # --- Tile / grid selection ------------------------------------------------
    # Big tiles amortize the ~0.35us/step pipeline overhead; a single block is
    # used when the whole batch fits.  Tile count is chosen first so padding
    # stays below 8 rows per tile.
    tm_target = 4096 if tm is None else max(8, int(tm))
    tm_target = min(tm_target, tm_cap)
    n_tiles = max(1, _cdiv(B, tm_target))
    if is_v7x and n_tiles == 1 and B >= 2048:
        n_tiles = 2                    # keep both v7x TensorCores busy
    tm = min(_round_up(_cdiv(B, n_tiles), 8), tm_cap)
    Bp = n_tiles * tm
    if Bp < B:                         # only if tm_cap forced tm down
        n_tiles = _cdiv(B, tm)
        Bp = n_tiles * tm
    if Bp != B:
        x = jnp.pad(x, ((0, Bp - B), (0, 0)))
    grid = (n_tiles,)

    vmem_limit = int(min(max(per_row_bytes * tm + 2 * param_pad_bytes + slack,
                             32 * 1024 * 1024),
                         vmem_cap))

    # Scheduling hint for XLA around the custom call.
    param_bytes = 4 * (D * H + H + H * H + H + H + 1)
    cost = pl.CostEstimate(flops=2 * Bp * (D * H + H * H + H),
                           transcendentals=0,
                           bytes_accessed=Bp * D * 4 + param_bytes + Bp * 4)

    x_spec = pl.BlockSpec((tm, D), lambda i: (i, 0))
    out_spec = pl.BlockSpec((1, 1, tm), lambda i: (i, 0, 0))
    # Weights/biases: full-array blocks with constant index_map -> VMEM-resident
    # across all batch tiles (no per-step re-DMA).
    param_specs = [
        pl.BlockSpec(w1.shape, lambda i: (0, 0)),
        pl.BlockSpec(b1.shape, lambda i: (0, 0)),
        pl.BlockSpec(w2.shape, lambda i: (0, 0)),
        pl.BlockSpec(b2.shape, lambda i: (0, 0)),
        pl.BlockSpec(w3r.shape, lambda i: (0, 0)),
        pl.BlockSpec(b3r.shape, lambda i: (0, 0)),
    ]

    out = pl.pallas_call(
        _value_kernel,
        out_shape=jax.ShapeDtypeStruct((n_tiles, 1, tm), jnp.float32),
        grid=grid,
        in_specs=[x_spec] + param_specs,
        out_specs=out_spec,
        compiler_params=pltpu.CompilerParams(
            dimension_semantics=("parallel",),
            vmem_limit_bytes=vmem_limit,
        ),
        cost_estimate=cost,
    )(x, w1, b1, w2, b2, w3r, b3r)

    # squeeze_output=True in the PyTorch MLP -> (B,)
    return out.reshape(-1)[:B]


def init_value_params(key, state_dim, hidden_dim):
    """PyTorch-Linear-style init. Weights stored as (in, out); biases (1, out)."""
    dims = [state_dim, hidden_dim, hidden_dim, 1]
    params = []
    for i in range(len(dims) - 1):
        fan_in, fan_out = dims[i], dims[i + 1]
        key, kw, kb = jax.random.split(key, 3)
        bound = 1.0 / (fan_in ** 0.5)
        w = jax.random.uniform(kw, (fan_in, fan_out), jnp.float32, -bound, bound)
        b = jax.random.uniform(kb, (1, fan_out), jnp.float32, -bound, bound)
        params.append(w)
        params.append(b)
    return params


def value_reference(state, params):
    w1, b1, w2, b2, w3, b3 = params
    x = state.astype(jnp.float32)
    h = jnp.maximum(x @ w1 + b1, 0.0)
    h = jnp.maximum(h @ w2 + b2, 0.0)
    return (h @ w3 + b3)[:, 0]


if __name__ == "__main__":
    STATE_DIM, HIDDEN_DIM = 24, 64
    BATCH = 200          # not a multiple of 8 -> exercises the pad/slice path

    key = jax.random.PRNGKey(0)
    k_params, k_state = jax.random.split(key, 2)

    params = init_value_params(k_params, STATE_DIM, HIDDEN_DIM)
    state = jax.random.normal(k_state, (BATCH, STATE_DIM), jnp.float32)

    ref = value_reference(state, params)

    # Default path: whole batch lives in a single VMEM-resident block (grid=(1,)).
    out = jax.block_until_ready(value_forward(state, params))
    assert out.shape == (BATCH,), out.shape
    assert jnp.allclose(out, ref, atol=1e-4, rtol=1e-4)

    # Forced multi-tile path: exercises the pipelined grid + lane-dense stores.
    out_tiled = jax.block_until_ready(value_forward(state, params, tm=64))
    assert out_tiled.shape == (BATCH,), out_tiled.shape
    assert jnp.allclose(out_tiled, ref, atol=1e-4, rtol=1e-4)

    print("KERNEL_OK")
</pallas_src>

<mosaic_0001>
module attributes {stable_mosaic.version = 11 : i64} {
  func.func @_value_kernel(%arg0: i32, %arg1: memref<200x24xf32, #tpu.memory_space<vmem>>, %arg2: memref<24x64xf32, #tpu.memory_space<vmem>>, %arg3: memref<1x64xf32, #tpu.memory_space<vmem>>, %arg4: memref<64x64xf32, #tpu.memory_space<vmem>>, %arg5: memref<1x64xf32, #tpu.memory_space<vmem>>, %arg6: memref<1x64xf32, #tpu.memory_space<vmem>>, %arg7: memref<1x1xf32, #tpu.memory_space<vmem>>, %arg8: memref<1x1x200xf32, #tpu.memory_space<vmem>>) attributes {dimension_semantics = [#tpu.dimension_semantics<parallel>], iteration_bounds = array<i64: 1>, scalar_prefetch = 0 : i64, scratch_operands = 0 : i64, tpu.core_type = #tpu.core_type<tc>, window_params = [{transform_indices = @transform_0, window_bounds = array<i64: 200, 24>}, {pipeline_mode = #tpu.pipeline_mode<synchronous>, transform_indices = @transform_1, window_bounds = array<i64: 24, 64>}, {pipeline_mode = #tpu.pipeline_mode<synchronous>, transform_indices = @transform_2, window_bounds = array<i64: 1, 64>}, {pipeline_mode = #tpu.pipeline_mode<synchronous>, transform_indices = @transform_3, window_bounds = array<i64: 64, 64>}, {pipeline_mode = #tpu.pipeline_mode<synchronous>, transform_indices = @transform_4, window_bounds = array<i64: 1, 64>}, {pipeline_mode = #tpu.pipeline_mode<synchronous>, transform_indices = @transform_5, window_bounds = array<i64: 1, 64>}, {pipeline_mode = #tpu.pipeline_mode<synchronous>, transform_indices = @transform_6, window_bounds = array<i64: 1, 1>}, {transform_indices = @transform_7, window_bounds = array<i64: 1, 1, 200>}]} {
    %c0 = arith.constant 0 : index
    %c0_0 = arith.constant 0 : index
    %0 = vector.load %arg1[%c0, %c0_0] : memref<200x24xf32, #tpu.memory_space<vmem>>, vector<200x24xf32>
    %c0_1 = arith.constant 0 : index
    %c0_2 = arith.constant 0 : index
    %1 = vector.load %arg2[%c0_1, %c0_2] : memref<24x64xf32, #tpu.memory_space<vmem>>, vector<24x64xf32>
    %cst = arith.constant dense<0.000000e+00> : vector<200x64xf32>
    %2 = tpu.matmul %0, %1, %cst {dimension_numbers = #tpu.dot_dimension_numbers<[1], [0], [0], [1], [0, 0, 1, 1], [], []>} : vector<200x24xf32>, vector<24x64xf32>, vector<200x64xf32> -> vector<200x64xf32>
    %c0_3 = arith.constant 0 : index
    %c0_4 = arith.constant 0 : index
    %3 = vector.load %arg3[%c0_3, %c0_4] : memref<1x64xf32, #tpu.memory_space<vmem>>, vector<1x64xf32>
    %4 = vector.broadcast %3 : vector<1x64xf32> to vector<200x64xf32>
    %5 = arith.addf %2, %4 : vector<200x64xf32>
    %cst_5 = arith.constant 0.000000e+00 : f32
    %6 = vector.broadcast %cst_5 : f32 to vector<200x64xf32>
    %7 = arith.maximumf %5, %6 : vector<200x64xf32>
    %c0_6 = arith.constant 0 : index
    %c0_7 = arith.constant 0 : index
    %8 = vector.load %arg4[%c0_6, %c0_7] : memref<64x64xf32, #tpu.memory_space<vmem>>, vector<64x64xf32>
    %cst_8 = arith.constant dense<0.000000e+00> : vector<200x64xf32>
    %9 = tpu.matmul %7, %8, %cst_8 {dimension_numbers = #tpu.dot_dimension_numbers<[1], [0], [0], [1], [0, 0, 1, 1], [], []>} : vector<200x64xf32>, vector<64x64xf32>, vector<200x64xf32> -> vector<200x64xf32>
    %c0_9 = arith.constant 0 : index
    %c0_10 = arith.constant 0 : index
    %10 = vector.load %arg5[%c0_9, %c0_10] : memref<1x64xf32, #tpu.memory_space<vmem>>, vector<1x64xf32>
    %11 = vector.broadcast %10 : vector<1x64xf32> to vector<200x64xf32>
    %12 = arith.addf %9, %11 : vector<200x64xf32>
    %cst_11 = arith.constant 0.000000e+00 : f32
    %13 = vector.broadcast %cst_11 : f32 to vector<200x64xf32>
    %14 = arith.maximumf %12, %13 : vector<200x64xf32>
    %c0_12 = arith.constant 0 : index
    %c0_13 = arith.constant 0 : index
    %15 = vector.load %arg6[%c0_12, %c0_13] : memref<1x64xf32, #tpu.memory_space<vmem>>, vector<1x64xf32>
    %16 = vector.broadcast %15 : vector<1x64xf32> to vector<200x64xf32>
    %17 = arith.mulf %14, %16 : vector<200x64xf32>
    %cst_14 = arith.constant dense<0.000000e+00> : vector<200xf32>
    %18 = vector.multi_reduction <add>, %17, %cst_14 [1] : vector<200x64xf32> to vector<200xf32>
    %19 = vector.shape_cast %18 : vector<200xf32> to vector<1x200xf32>
    %c0_15 = arith.constant 0 : index
    %c0_16 = arith.constant 0 : index
    %20 = vector.load %arg7[%c0_15, %c0_16] : memref<1x1xf32, #tpu.memory_space<vmem>>, vector<1x1xf32>
    %21 = vector.broadcast %20 : vector<1x1xf32> to vector<1x200xf32>
    %22 = arith.addf %19, %21 : vector<1x200xf32>
    %23 = vector.shape_cast %22 : vector<1x200xf32> to vector<1x1x200xf32>
    %c0_17 = arith.constant 0 : index
    %c0_18 = arith.constant 0 : index
    %c0_19 = arith.constant 0 : index
    %24 = vector.load %arg8[%c0_17, %c0_18, %c0_19] : memref<1x1x200xf32, #tpu.memory_space<vmem>>, vector<1x1x200xf32>
    tpu.vector_store %arg8[%c0_17, %c0_18, %c0_19], %23 {strides = array<i32>} : memref<1x1x200xf32, #tpu.memory_space<vmem>>, vector<1x1x200xf32>,
    return
  }
  func.func @transform_0(%arg0: i32) -> (i32, i32) {
    %c0_i32 = arith.constant 0 : i32
    %c0_i32_0 = arith.constant 0 : i32
    return %arg0, %c0_i32 : i32, i32
  }
  func.func @transform_1(%arg0: i32) -> (i32, i32) {
    %c0_i32 = arith.constant 0 : i32
    %c0_i32_0 = arith.constant 0 : i32
    %c0_i32_1 = arith.constant 0 : i32
    return %c0_i32, %c0_i32_0 : i32, i32
  }
  func.func @transform_2(%arg0: i32) -> (i32, i32) {
    %c0_i32 = arith.constant 0 : i32
    %c0_i32_0 = arith.constant 0 : i32
    %c0_i32_1 = arith.constant 0 : i32
    return %c0_i32, %c0_i32_0 : i32, i32
  }
  func.func @transform_3(%arg0: i32) -> (i32, i32) {
    %c0_i32 = arith.constant 0 : i32
    %c0_i32_0 = arith.constant 0 : i32
    %c0_i32_1 = arith.constant 0 : i32
    return %c0_i32, %c0_i32_0 : i32, i32
  }
  func.func @transform_4(%arg0: i32) -> (i32, i32) {
    %c0_i32 = arith.constant 0 : i32
    %c0_i32_0 = arith.constant 0 : i32
    %c0_i32_1 = arith.constant 0 : i32
    return %c0_i32, %c0_i32_0 : i32, i32
  }
  func.func @transform_5(%arg0: i32) -> (i32, i32) {
    %c0_i32 = arith.constant 0 : i32
    %c0_i32_0 = arith.constant 0 : i32
    %c0_i32_1 = arith.constant 0 : i32
    return %c0_i32, %c0_i32_0 : i32, i32
  }
  func.func @transform_6(%arg0: i32) -> (i32, i32) {
    %c0_i32 = arith.constant 0 : i32
    %c0_i32_0 = arith.constant 0 : i32
    %c0_i32_1 = arith.constant 0 : i32
    return %c0_i32, %c0_i32_0 : i32, i32
  }
  func.func @transform_7(%arg0: i32) -> (i32, i32, i32) {
    %c0_i32 = arith.constant 0 : i32
    %c0_i32_0 = arith.constant 0 : i32
    %c0_i32_1 = arith.constant 0 : i32
    return %arg0, %c0_i32, %c0_i32_0 : i32, i32, i32
  }
}

</mosaic_0001>

<bundles_post_ra>
// kernel: tpu_custom_call.1
= control target key start
LH: loop header
LB: loop body
LE: loop exit
PB: predicated region body
PF: predicated region fallthrough
CT: control target
= control target key end

     0   :  { %s1805_s0 = inlined_call_operand.vmem [shape: f32[200,24], index: 0, kind: input, shape index: {}]   ;;  %s1806_s1 = inlined_call_operand.vmem [shape: f32[24,64], index: 1, kind: input, shape index: {}]   ;;  %s1807_s2 = inlined_call_operand.vmem [shape: f32[1,64], index: 2, kind: input, shape index: {}]   ;;  %s1808_s3 = inlined_call_operand.vmem [shape: f32[64,64], index: 3, kind: input, shape index: {}]   ;;  %s1809_s4 = inlined_call_operand.vmem [shape: f32[1,64], index: 4, kind: input, shape index: {}]   ;;  %s1810_s5 = inlined_call_operand.vmem [shape: f32[1,64], index: 5, kind: input, shape index: {}]   ;;  %s1811_s6 = inlined_call_operand.<no memory space> [shape: f32[1,1], index: 6, kind: input, shape index: {}]   ;;  %s1812_s7 = inlined_call_operand.hbm [shape: f32[1,1,200], index: 7, kind: output, shape index: {}]  }
   0x1   :  { %v12_v0 = vstv %s1811_s6 }
   0x2   :  { %13 = vst [vmem:[#allocation2] sm:$0x1] %v12_v0 }
   0x3   :  { %v56_v1 = vld [vmem:[%s1806_s1 + $0x10] sm:$0xff]  ;;  %v55_v2 = vld [vmem:[%s1806_s1 + $0x8] sm:$0xff]  ;;  %v54_v3 = vld [vmem:[%s1806_s1] sm:$0xff]  ;;  %vm61_vm0 = vcmask 195584  }
   0x4   :  { %150 = vmatpush.msra.mxu0 %v56_v1  ;;  %1282 = vmatpush.msra.mxu3 %v56_v1  ;;  %v29_v4 = vld [vmem:[%s1805_s0] sm:$0xff]  ;;  %v43_v5 = vld [vmem:[%s1805_s0 + $0x70] sm:$0xff] }
   0x6   :  { %151 = vmatpush.msra.mxu0 %v55_v2  ;;  %1283 = vmatpush.msra.mxu3 %v55_v2 }
   0x8   :  { %152 = vmatpush.msra.mxu0 %v54_v3  ;;  %1284 = vmatpush.msra.mxu3 %v54_v3 }
   0x9   :  { %14 = vsyncpa [#allocation4], 0  ;;  %1232 = vmatmul.msk.f32.vlgmr.msra.gmra.mxu0 %vm61_vm0, %v29_v4  ;;  %1246 = vmatmul.msk.f32.vlgmr.msra.gmra.mxu3 %vm61_vm0, %v43_v5  ;;  %v30_v6 = vld [vmem:[%s1805_s0 + $0x8] sm:$0xff]  ;;  %v44_v7 = vld [vmem:[%s1805_s0 + $0x78] sm:$0xff]  ;;  %vm266_vm1 = vcmask 523264   ;;  %vm1132_vm2 = vcmask 130112  }
   0xa   :  { %v31_v8 = vld [vmem:[%s1805_s0 + $0x10] sm:$0xff]  ;;  %v45_v9 = vld [vmem:[%s1805_s0 + $0x80] sm:$0xff]  ;;  %v32_v10 = vld [vmem:[%s1805_s0 + $0x18] sm:$0xff]  ;;  %vm1136_vm3 = vcmask 195712   ;;  %vm1140_vm4 = vcmask 261312   ;;  %vm1144_vm5 = vcmask 326912  }
   0xb   :  { %v46_v11 = vld [vmem:[%s1805_s0 + $0x88] sm:$0xff]  ;;  %v33_v12 = vld [vmem:[%s1805_s0 + $0x20] sm:$0xff]  ;;  %v47_v13 = vld [vmem:[%s1805_s0 + $0x90] sm:$0xff]  ;;  %vm1148_vm6 = vcmask 392512   ;;  %vm1152_vm7 = vcmask 458112   ;;  %vm1156_vm8 = vcmask 523712  }
   0xc   :  { %v34_v14 = vld [vmem:[%s1805_s0 + $0x28] sm:$0xff]  ;;  %v48_v15 = vld [vmem:[%s1805_s0 + $0x98] sm:$0xff]  ;;  %v35_v16 = vld [vmem:[%s1805_s0 + $0x30] sm:$0xff]  ;;  %vm1160_vm9 = vcmask 589312   ;;  %vm1164_vm10 = vcmask 654912   ;;  %vm1168_vm11 = vcmask 720512  }
   0xd   :  { %v49_v17 = vld [vmem:[%s1805_s0 + $0xa0] sm:$0xff]  ;;  %v36_v18 = vld [vmem:[%s1805_s0 + $0x38] sm:$0xff]  ;;  %v50_v19 = vld [vmem:[%s1805_s0 + $0xa8] sm:$0xff]  ;;  %vm1172_vm12 = vcmask 786112   ;;  %vm1176_vm13 = vcmask 851712   ;;  %vm1180_vm14 = vcmask 917312  }
   0xe   :  { %v37_v20 = vld [vmem:[%s1805_s0 + $0x40] sm:$0xff]  ;;  %v51_v21 = vld [vmem:[%s1805_s0 + $0xb0] sm:$0xff]  ;;  %v38_v22 = vld [vmem:[%s1805_s0 + $0x48] sm:$0xff]  ;;  %vm1184_vm15 = vcmask 982912   ;;  %s1223_s28 = sshll.u32 %s1812_s7, 4  ;;  %s1224_s28 = int_to_ptr.hbm [resolvable:$true] %s1223_s28 }
   0xf   :  { %v52_v23 = vld [vmem:[%s1805_s0 + $0xb8] sm:$0xff]  ;;  %v260_v25 = vld [vmem:[%s1808_s3 + $0x30] sm:$0xff]  ;;  %v259_v26 = vld [vmem:[%s1808_s3 + $0x28] sm:$0xff] }
  0x10   :  { %v261_v24 = vld [vmem:[%s1808_s3 + $0x38] sm:$0xff]  ;;  %v258_v27 = vld [vmem:[%s1808_s3 + $0x20] sm:$0xff]  ;;  %v39_v28 = vld [vmem:[%s1805_s0 + $0x50] sm:$0xff] }
  0x11   :  { %1233 = vmatmul.msk.f32.gmra.mxu0 %vm61_vm0, %v30_v6  ;;  %1247 = vmatmul.msk.f32.gmra.mxu3 %vm61_vm0, %v44_v7  ;;  %v53_v29 = vld [vmem:[%s1805_s0 + $0xc0] sm:$0xff]  ;;  %v257_v30 = vld [vmem:[%s1808_s3 + $0x18] sm:$0xff]  ;;  %v256_v32 = vld [vmem:[%s1808_s3 + $0x10] sm:$0xff]  ;;  %v1335_v7 = vmov 0  }
  0x12   :  { %350 = vmatpush.msra.mxu1 %v261_v24  ;;  %1286 = vmatpush.msrb.mxu3 %v261_v24  ;;  %v40_v31 = vld [vmem:[%s1805_s0 + $0x58] sm:$0xff]  ;;  %v41_v33 = vld [vmem:[%s1805_s0 + $0x60] sm:$0xff]  ;;  %v255_v34 = vld [vmem:[%s1808_s3 + $0x8] sm:$0xff] }
  0x13   :  { %1285 = vmatpush.msra.mxu2 %v261_v24  ;;  %v254_v35 = vld [vmem:[%s1808_s3] sm:$0xff]  ;;  %v42_v36 = vld [vmem:[%s1805_s0 + $0x68] sm:$0xff]  ;;  %1303 = vset.pattern.permute.xlu0 %v1335_v7 }
  0x14   :  { %351 = vmatpush.msra.mxu1 %v260_v25  ;;  %1288 = vmatpush.msrb.mxu3 %v260_v25  ;;  %v1516_v37 = vld [vmem:[%s1807_s2] ss:$0 sm:$0xff]  ;;  %v563_v5 = vld [vmem:[#allocation2] sm:$0x1] }
  0x15   :  { %1287 = vmatpush.msra.mxu2 %v260_v25  ;;  %1304 = vset.pattern.permute.xlu1 %v1335_v7 }
  0x16   :  { %352 = vmatpush.msra.mxu1 %v259_v26  ;;  %1290 = vmatpush.msrb.mxu3 %v259_v26 }
  0x17   :  { %1289 = vmatpush.msra.mxu2 %v259_v26  ;;  %566 = vperm.xlu0 %1303, %v563_v5  }
  0x18   :  { %353 = vmatpush.msra.mxu1 %v258_v27  ;;  %1292 = vmatpush.msrb.mxu3 %v258_v27 }
  0x19   :  { %1234 = vmatmul.msk.f32.gmra.mxu0 %vm61_vm0, %v31_v8  ;;  %1248 = vmatmul.msk.f32.gmra.mxu3 %vm61_vm0, %v45_v9 }
  0x1a   :  { %354 = vmatpush.msra.mxu1 %v257_v30  ;;  %1294 = vmatpush.msrb.mxu3 %v257_v30 }
  0x1b   :  { %1291 = vmatpush.msra.mxu2 %v258_v27  ;;  %1305 = vset.pattern.permute.xlu2 %v1335_v7 }
  0x1c   :  { %355 = vmatpush.msra.mxu1 %v256_v32  ;;  %1296 = vmatpush.msrb.mxu3 %v256_v32 }
  0x1d   :  { %1293 = vmatpush.msra.mxu2 %v257_v30 }
  0x1e   :  { %356 = vmatpush.msra.mxu1 %v255_v34  ;;  %1298 = vmatpush.msrb.mxu3 %v255_v34 }
  0x1f   :  { %1295 = vmatpush.msra.mxu2 %v256_v32 }
  0x20   :  { %357 = vmatpush.msra.mxu1 %v254_v35  ;;  %1300 = vmatpush.msrb.mxu3 %v254_v35 }
  0x21   :  { %1235 = vmatmul.msk.f32.gmra.mxu0 %vm61_vm0, %v32_v10  ;;  %1249 = vmatmul.msk.f32.gmra.mxu3 %vm61_vm0, %v46_v11 }
  0x22   :  { %1297 = vmatpush.msra.mxu2 %v255_v34 }
  0x24   :  { %1299 = vmatpush.msra.mxu2 %v254_v35 }
  0x29   :  { %1236 = vmatmul.msk.f32.gmra.mxu0 %vm61_vm0, %v33_v12  ;;  %1250 = vmatmul.msk.f32.gmra.mxu3 %vm61_vm0, %v47_v13 }
  0x31   :  { %1237 = vmatmul.msk.f32.gmra.mxu0 %vm61_vm0, %v34_v14  ;;  %1251 = vmatmul.msk.f32.gmra.mxu3 %vm61_vm0, %v48_v15 }
  0x39   :  { %1238 = vmatmul.msk.f32.gmra.mxu0 %vm61_vm0, %v35_v16  ;;  %1252 = vmatmul.msk.f32.gmra.mxu3 %vm61_vm0, %v49_v17 }
  0x41   :  { %1239 = vmatmul.msk.f32.gmra.mxu0 %vm61_vm0, %v36_v18  ;;  %1253 = vmatmul.msk.f32.gmra.mxu3 %vm61_vm0, %v50_v19 }
  0x49   :  { %1240 = vmatmul.msk.f32.gmra.mxu0 %vm61_vm0, %v37_v20  ;;  %1254 = vmatmul.msk.f32.gmra.mxu3 %vm61_vm0, %v51_v21 }
  0x51   :  { %1241 = vmatmul.msk.f32.gmra.mxu0 %vm61_vm0, %v38_v22  ;;  %1255 = vmatmul.msk.f32.gmra.mxu3 %vm61_vm0, %v52_v23 }
  0x59   :  { %1242 = vmatmul.msk.f32.gmra.mxu0 %vm61_vm0, %v39_v28  ;;  %1256 = vmatmul.msk.f32.gmra.mxu3 %vm61_vm0, %v53_v29 }
  0x61   :  { %1243 = vmatmul.msk.f32.gmra.mxu0 %vm61_vm0, %v40_v31 }
  0x69   :  { %1244 = vmatmul.msk.f32.gmra.mxu0 %vm61_vm0, %v41_v33 }
  0x71   :  { %1245 = vmatmul.msk.f32.gmra.mxu0 %vm61_vm0, %v42_v36  ;;  %v1579_v36 = vld [vmem:[%s1809_s4] ss:$0 sm:$0xff]  ;;  %vm1188_vm0 = vcmask 1048512   ;;  %s1336_s4 = smov [#allocation3]  }
  0x86   :  { %v154_v38 = vpop.f32.mrf.mxu0 }
  0x87   :  { %v155_v39 = vadd.f32 %v1516_v37, %v154_v38 }
  0x89   :  { %v229_v40 = vmax.f32 %v155_v39, 0.0 }
  0x8b   :  { %1257 = vmatmul.msk.f32.vlgmr.msra.gmra.mxu1 %vm266_vm1, %v229_v40 }
  0x8c   :  { %v1520_v41 = vpop.f32.mrf.mxu3 }
  0x8d   :  { %v197_v31 = vadd.f32 %v1516_v37, %v1520_v41  ;;  %v1585_v41 = vld [vmem:[%s1810_s5] ss:$0 sm:$0xff]  ;;  %s1221_s5 = sshll.u32 %s1336_s4, 4  ;;  %s1222_s5 = int_to_ptr.vmem [resolvable:$true] %s1221_s5 }
  0x8e   :  { %v157_v42 = vpop.f32.mrf.mxu0 }
  0x8f   :  { %v158_v43 = vadd.f32 %v1516_v37, %v157_v42  ;;  %v243_v32 = vmax.f32 %v197_v31, 0.0 }
  0x91   :  { %v230_v44 = vmax.f32 %v158_v43, 0.0 }
  0x93   :  { %1258 = vmatmul.msk.f32.gmra.mxu1 %vm266_vm1, %v230_v44 }
  0x94   :  { %v1524_v45 = vpop.f32.mrf.mxu3 }
  0x95   :  { %v200_v33 = vadd.f32 %v1516_v37, %v1524_v45 }
  0x96   :  { %v160_v46 = vpop.f32.mrf.mxu0 }
  0x97   :  { %v161_v47 = vadd.f32 %v1516_v37, %v160_v46  ;;  %v244_v34 = vmax.f32 %v200_v33, 0.0 }
  0x99   :  { %v231_v48 = vmax.f32 %v161_v47, 0.0 }
  0x9b   :  { %1259 = vmatmul.msk.f32.gmra.mxu1 %vm266_vm1, %v231_v48 }
  0x9c   :  { %v1528_v49 = vpop.f32.mrf.mxu3 }
  0x9d   :  { %v203_v35 = vadd.f32 %v1516_v37, %v1528_v49 }
  0x9e   :  { %v163_v50 = vpop.f32.mrf.mxu0 }
  0x9f   :  { %v164_v51 = vadd.f32 %v1516_v37, %v163_v50  ;;  %v245_v39 = vmax.f32 %v203_v35, 0.0 }
  0xa1   :  { %v232_v52 = vmax.f32 %v164_v51, 0.0 }
  0xa3   :  { %1260 = vmatmul.msk.f32.gmra.mxu1 %vm266_vm1, %v232_v52 }
  0xa4   :  { %v1532_v53 = vpop.f32.mrf.mxu3 }
  0xa5   :  { %v206_v43 = vadd.f32 %v1516_v37, %v1532_v53 }
  0xa6   :  { %v166_v54 = vpop.f32.mrf.mxu0 }
  0xa7   :  { %v167_v55 = vadd.f32 %v1516_v37, %v166_v54  ;;  %v246_v47 = vmax.f32 %v206_v43, 0.0 }
  0xa9   :  { %v233_v56 = vmax.f32 %v167_v55, 0.0 }
  0xab   :  { %1261 = vmatmul.msk.f32.gmra.mxu1 %vm266_vm1, %v233_v56 }
  0xac   :  { %v1536_v57 = vpop.f32.mrf.mxu3 }
  0xad   :  { %v209_v50 = vadd.f32 %v1516_v37, %v1536_v57 }
  0xae   :  { %v169_v58 = vpop.f32.mrf.mxu0 }
  0xaf   :  { %v170_v59 = vadd.f32 %v1516_v37, %v169_v58  ;;  %v247_v54 = vmax.f32 %v209_v50, 0.0 }
  0xb1   :  { %v234_v60 = vmax.f32 %v170_v59, 0.0 }
  0xb3   :  { %1262 = vmatmul.msk.f32.gmra.mxu1 %vm266_vm1, %v234_v60 }
  0xb4   :  { %v1540_v61 = vpop.f32.mrf.mxu3 }
  0xb5   :  { %v212_v58 = vadd.f32 %v1516_v37, %v1540_v61 }
  0xb6   :  { %v172_v62 = vpop.f32.mrf.mxu0 }
  0xb7   :  { %v173_v63 = vadd.f32 %v1516_v37, %v172_v62  ;;  %v248_v62 = vmax.f32 %v212_v58, 0.0 }
  0xb9   :  { %v235_v0 = vmax.f32 %v173_v63, 0.0 }
  0xbb   :  { %1263 = vmatmul.msk.f32.gmra.mxu1 %vm266_vm1, %v235_v0 }
  0xbc   :  { %v1544_v1 = vpop.f32.mrf.mxu3 }
  0xbe   :  { %v175_v2 = vpop.f32.mrf.mxu0 }
  0xbf   :  { %v176_v3 = vadd.f32 %v1516_v37, %v175_v2  ;;  %v215_v2 = vadd.f32 %v1516_v37, %v1544_v1 }
  0xc1   :  { %v236_v4 = vmax.f32 %v176_v3, 0.0  ;;  %v249_v5 = vmax.f32 %v215_v2, 0.0 }
  0xc3   :  { %1264 = vmatmul.msk.f32.gmra.mxu1 %vm266_vm1, %v236_v4 }
  0xc4   :  { %v1548_v6 = vpop.f32.mrf.mxu3 }
  0xc6   :  { %v178_v8 = vpop.f32.mrf.mxu0 }
  0xc7   :  { %v179_v9 = vadd.f32 %v1516_v37, %v178_v8 }
  0xc9   :  { %v237_v10 = vmax.f32 %v179_v9, 0.0  ;;  %v218_v9 = vadd.f32 %v1516_v37, %v1548_v6 }
  0xcb   :  { %1265 = vmatmul.msk.f32.gmra.mxu1 %vm266_vm1, %v237_v10 }
  0xcc   :  { %v1552_v11 = vpop.f32.mrf.mxu3 }
  0xce   :  { %v181_v12 = vpop.f32.mrf.mxu0 }
  0xcf   :  { %v182_v13 = vadd.f32 %v1516_v37, %v181_v12 }
  0xd1   :  { %v238_v14 = vmax.f32 %v182_v13, 0.0  ;;  %v250_v13 = vmax.f32 %v218_v9, 0.0 }
  0xd3   :  { %1266 = vmatmul.msk.f32.gmra.mxu1 %vm266_vm1, %v238_v14 }
  0xd4   :  { %v1556_v15 = vpop.f32.mrf.mxu3 }
  0xd6   :  { %v184_v16 = vpop.f32.mrf.mxu0 }
  0xd7   :  { %v185_v17 = vadd.f32 %v1516_v37, %v184_v16 }
  0xd9   :  { %v239_v18 = vmax.f32 %v185_v17, 0.0  ;;  %v221_v17 = vadd.f32 %v1516_v37, %v1552_v11 }
  0xdb   :  { %1267 = vmatmul.msk.f32.gmra.mxu1 %vm266_vm1, %v239_v18 }
  0xdc   :  { %v226_v19 = vpop.f32.mrf.mxu3 }
  0xdd   :  { %v227_v20 = vadd.f32 %v1516_v37, %v226_v19 }
  0xde   :  { %v187_v21 = vpop.f32.mrf.mxu0 }
  0xdf   :  { %v253_v22 = vmax.f32 %v227_v20, 0.0  ;;  %v188_v23 = vadd.f32 %v1516_v37, %v187_v21  ;;  %v251_v20 = vmax.f32 %v221_v17, 0.0 }
  0xe1   :  { %v240_v24 = vmax.f32 %v188_v23, 0.0  ;;  %1281 = vmatmul.msk.f32.vlgmr.msrb.gmra.mxu3 %vm266_vm1, %v253_v22  ;;  %v224_v23 = vadd.f32 %v1516_v37, %v1556_v15 }
  0xe3   :  { %1268 = vmatmul.msk.f32.gmra.mxu1 %vm266_vm1, %v240_v24 }
  0xe6   :  { %v190_v25 = vpop.f32.mrf.mxu0 }
  0xe7   :  { %v191_v26 = vadd.f32 %v1516_v37, %v190_v25 }
  0xe9   :  { %v241_v27 = vmax.f32 %v191_v26, 0.0  ;;  %v252_v26 = vmax.f32 %v224_v23, 0.0 }
  0xeb   :  { %1269 = vmatmul.msk.f32.vlgmr.msra.gmra.mxu2 %vm266_vm1, %v241_v27 }
  0xee   :  { %v193_v28 = vpop.f32.mrf.mxu0 }
  0xef   :  { %v194_v29 = vadd.f32 %v1516_v37, %v193_v28 }
  0xf1   :  { %v242_v30 = vmax.f32 %v194_v29, 0.0 }
  0xf3   :  { %1270 = vmatmul.msk.f32.gmra.mxu2 %vm266_vm1, %v242_v30 }
  0xfb   :  { %1271 = vmatmul.msk.f32.gmra.mxu2 %vm266_vm1, %v243_v32 }
 0x103   :  { %1272 = vmatmul.msk.f32.gmra.mxu2 %vm266_vm1, %v244_v34 }
 0x108   :  { %v359_v38 = vpop.f32.mrf.mxu1 }
 0x109   :  { %v360_v40 = vadd.f32 %v1579_v36, %v359_v38 }
 0x10b   :  { %v434_v42 = vmax.f32 %v360_v40, 0.0  ;;  %1273 = vmatmul.msk.f32.gmra.mxu2 %vm266_vm1, %v245_v39 }
 0x10d   :  { %v463_v44 = vmul.f32 %v1585_v41, %v434_v42 }
 0x10f   :  { %v488_v45 = vsel %vm266_vm1, %v463_v44, 0.0 }
 0x110   :  { %v362_v46 = vpop.f32.mrf.mxu1  ;;  %489 = vadd.xlane.f32.xlu0 %v488_v45 }
 0x111   :  { %v363_v48 = vadd.f32 %v1579_v36, %v362_v46 }
 0x113   :  { %v435_v49 = vmax.f32 %v363_v48, 0.0  ;;  %1274 = vmatmul.msk.f32.gmra.mxu2 %vm266_vm1, %v246_v47 }
 0x115   :  { %v464_v51 = vmul.f32 %v1585_v41, %v435_v49 }
 0x117   :  { %v491_v52 = vsel %vm266_vm1, %v464_v51, 0.0 }
 0x118   :  { %v365_v53 = vpop.f32.mrf.mxu1  ;;  %492 = vadd.xlane.f32.xlu1 %v491_v52 }
 0x119   :  { %v366_v55 = vadd.f32 %v1579_v36, %v365_v53 }
 0x11b   :  { %v436_v56 = vmax.f32 %v366_v55, 0.0  ;;  %1275 = vmatmul.msk.f32.gmra.mxu2 %vm266_vm1, %v247_v54 }
 0x11d   :  { %v465_v59 = vmul.f32 %v1585_v41, %v436_v56 }
 0x11f   :  { %v494_v60 = vsel %vm266_vm1, %v465_v59, 0.0 }
 0x120   :  { %v368_v57 = vpop.f32.mrf.mxu1  ;;  %495 = vadd.xlane.f32.xlu1 %v494_v60 }
 0x121   :  { %v369_v63 = vadd.f32 %v1579_v36, %v368_v57 }
 0x123   :  { %v437_v0 = vmax.f32 %v369_v63, 0.0  ;;  %1276 = vmatmul.msk.f32.gmra.mxu2 %vm266_vm1, %v248_v62 }
 0x125   :  { %v466_v3 = vmul.f32 %v1585_v41, %v437_v0 }
 0x127   :  { %v497_v4 = vsel %vm266_vm1, %v466_v3, 0.0  ;;  %v567_v3 = vpop.permute.xlu0 %566 }
 0x128   :  { %v371_v61 = vpop.f32.mrf.mxu1  ;;  %498 = vadd.xlane.f32.xlu2 %v497_v4  ;;  %v1654_v9 = vperm.slane %v567_v3, 0 }
 0x129   :  { %v372_v7 = vadd.f32 %v1579_v36, %v371_v61 }
 0x12b   :  { %v438_v8 = vmax.f32 %v372_v7, 0.0  ;;  %1277 = vmatmul.msk.f32.gmra.mxu2 %vm266_vm1, %v249_v5 }
 0x12d   :  { %v467_v10 = vmul.f32 %v1585_v41, %v438_v8 }
 0x12f   :  { %v500_v12 = vsel %vm266_vm1, %v467_v10, 0.0 }
 0x130   :  { %v374_v1 = vpop.f32.mrf.mxu1  ;;  %501 = vadd.xlane.f32.xlu2 %v500_v12 }
 0x131   :  { %v375_v14 = vadd.f32 %v1579_v36, %v374_v1 }
 0x133   :  { %v439_v16 = vmax.f32 %v375_v14, 0.0  ;;  %1278 = vmatmul.msk.f32.gmra.mxu2 %vm266_vm1, %v250_v13 }
 0x135   :  { %v468_v18 = vmul.f32 %v1585_v41, %v439_v16 }
 0x137   :  { %v503_v19 = vsel %vm266_vm1, %v468_v18, 0.0 }
 0x138   :  { %v377_v6 = vpop.f32.mrf.mxu1  ;;  %504 = vadd.xlane.f32.xlu1 %v503_v19 }
 0x139   :  { %v378_v21 = vadd.f32 %v1579_v36, %v377_v6 }
 0x13b   :  { %v440_v22 = vmax.f32 %v378_v21, 0.0  ;;  %1279 = vmatmul.msk.f32.gmra.mxu2 %vm266_vm1, %v251_v20 }
 0x13d   :  { %v469_v24 = vmul.f32 %v1585_v41, %v440_v22 }
 0x13f   :  { %v506_v25 = vsel %vm266_vm1, %v469_v24, 0.0 }
 0x140   :  { %v380_v11 = vpop.f32.mrf.mxu1  ;;  %507 = vadd.xlane.f32.xlu2 %v506_v25 }
 0x141   :  { %v381_v27 = vadd.f32 %v1579_v36, %v380_v11 }
 0x143   :  { %v441_v28 = vmax.f32 %v381_v27, 0.0  ;;  %1280 = vmatmul.msk.f32.gmra.mxu2 %vm266_vm1, %v252_v26 }
 0x145   :  { %v470_v29 = vmul.f32 %v1585_v41, %v441_v28 }
 0x147   :  { %v509_v30 = vsel %vm266_vm1, %v470_v29, 0.0 }
 0x148   :  { %v383_v31 = vpop.f32.mrf.mxu1  ;;  %510 = vadd.xlane.f32.xlu1 %v509_v30 }
 0x149   :  { %v384_v37 = vadd.f32 %v1579_v36, %v383_v31 }
 0x14b   :  { %v442_v15 = vmax.f32 %v384_v37, 0.0 }
 0x14d   :  { %v471_v32 = vmul.f32 %v1585_v41, %v442_v15 }
 0x14f   :  { %v512_v33 = vsel %vm266_vm1, %v471_v32, 0.0 }
 0x150   :  { %v386_v34 = vpop.f32.mrf.mxu1  ;;  %513 = vadd.xlane.f32.xlu2 %v512_v33 }
 0x151   :  { %v387_v35 = vadd.f32 %v1579_v36, %v386_v34 }
 0x153   :  { %v443_v38 = vmax.f32 %v387_v35, 0.0 }
 0x155   :  { %v472_v39 = vmul.f32 %v1585_v41, %v443_v38 }
 0x157   :  { %v515_v40 = vsel %vm266_vm1, %v472_v39, 0.0 }
 0x158   :  { %v389_v42 = vpop.f32.mrf.mxu1  ;;  %516 = vadd.xlane.f32.xlu1 %v515_v40 }
 0x159   :  { %v390_v43 = vadd.f32 %v1579_v36, %v389_v42 }
 0x15b   :  { %v444_v44 = vmax.f32 %v390_v43, 0.0 }
 0x15d   :  { %v473_v45 = vmul.f32 %v1585_v41, %v444_v44 }
 0x15f   :  { %v518_v46 = vsel %vm266_vm1, %v473_v45, 0.0 }
 0x160   :  { %v392_v47 = vpop.f32.mrf.mxu1  ;;  %519 = vadd.xlane.f32.xlu2 %v518_v46 }
 0x161   :  { %v393_v48 = vadd.f32 %v1579_v36, %v392_v47 }
 0x163   :  { %v445_v49 = vmax.f32 %v393_v48, 0.0 }
 0x164   :  { %v431_v50 = vpop.f32.mrf.mxu3 }
 0x165   :  { %v432_v51 = vadd.f32 %v1579_v36, %v431_v50  ;;  %v474_v52 = vmul.f32 %v1585_v41, %v445_v49 }
 0x167   :  { %v458_v53 = vmax.f32 %v432_v51, 0.0  ;;  %v521_v54 = vsel %vm266_vm1, %v474_v52, 0.0 }
 0x168   :  { %522 = vadd.xlane.f32.xlu1 %v521_v54 }
 0x169   :  { %v487_v55 = vmul.f32 %v1585_v41, %v458_v53 }
 0x16b   :  { %v560_v56 = vsel %vm266_vm1, %v487_v55, 0.0 }
 0x16c   :  { %561 = vadd.xlane.f32.xlu0 %v560_v56 }
 0x16e   :  { %v395_v58 = vpop.f32.mrf.mxu2 }
 0x16f   :  { %v396_v59 = vadd.f32 %v1579_v36, %v395_v58 }
 0x171   :  { %v446_v60 = vmax.f32 %v396_v59, 0.0 }
 0x173   :  { %v475_v57 = vmul.f32 %v1585_v41, %v446_v60 }
 0x175   :  { %v524_v62 = vsel %vm266_vm1, %v475_v57, 0.0 }
 0x176   :  { %v398_v63 = vpop.f32.mrf.mxu2  ;;  %525 = vadd.xlane.f32.xlu2 %v524_v62 }
 0x177   :  { %v399_v0 = vadd.f32 %v1579_v36, %v398_v63 }
 0x179   :  { %v447_v2 = vmax.f32 %v399_v0, 0.0 }
 0x17b   :  { %v476_v4 = vmul.f32 %v1585_v41, %v447_v2 }
 0x17d   :  { %v527_v61 = vsel %vm266_vm1, %v476_v4, 0.0 }
 0x17e   :  { %v401_v5 = vpop.f32.mrf.mxu2  ;;  %528 = vadd.xlane.f32.xlu1 %v527_v61 }
 0x17f   :  { %v402_v7 = vadd.f32 %v1579_v36, %v401_v5 }
 0x181   :  { %v448_v8 = vmax.f32 %v402_v7, 0.0 }
 0x183   :  { %v490_v10 = vpop.xlane.xlu0 %489  ;;  %v477_v12 = vmul.f32 %v1585_v41, %v448_v8 }
 0x184   :  { %v570_v1 = vadd.f32 %v1654_v9, %v490_v10 }
 0x185   :  { %v530_v13 = vsel %vm266_vm1, %v477_v12, 0.0 }
 0x186   :  { %v620_v14 = vperm.slane %v570_v1, 0  ;;  %v621_v16 = vperm.slane %v570_v1, 1  ;;  %v622_v17 = vperm.slane %v570_v1, 2  ;;  %v404_v18 = vpop.f32.mrf.mxu2  ;;  %531 = vadd.xlane.f32.xlu2 %v530_v13  ;;  %v623_v19 = vperm.slane %v570_v1, 3 }
 0x187   :  { %v624_v6 = vperm.slane %v570_v1, 4  ;;  %v405_v20 = vadd.f32 %v1579_v36, %v404_v18  ;;  %v625_v21 = vperm.slane %v570_v1, 5  ;;  %v626_v22 = vperm.slane %v570_v1, 6 }
 0x188   :  { %820 = vst [vmem:[#allocation1] ss:$9 sm:$0xff] %v620_v14  ;;  %v627_v24 = vperm.slane %v570_v1, 7 }
 0x189   :  { %822 = vst [vmem:[#allocation1 + $0x1] ss:$9 sm:$0xff] %v621_v16  ;;  %v449_v23 = vmax.f32 %v405_v20, 0.0 }
 0x18a   :  { %824 = vst [vmem:[#allocation1 + $0x2] ss:$9 sm:$0xff] %v622_v17 }
 0x18b   :  { %826 = vst [vmem:[#allocation1 + $0x3] ss:$9 sm:$0xff] %v623_v19  ;;  %v493_v25 = vpop.xlane.xlu1 %492  ;;  %v478_v11 = vmul.f32 %v1585_v41, %v449_v23 }
 0x18c   :  { %828 = vst [vmem:[#allocation1 + $0x4] ss:$9 sm:$0xff] %v624_v6  ;;  %v571_v26 = vadd.f32 %v1654_v9, %v493_v25 }
 0x18d   :  { %830 = vst [vmem:[#allocation1 + $0x5] ss:$9 sm:$0xff] %v625_v21  ;;  %v533_v27 = vsel %vm266_vm1, %v478_v11, 0.0 }
 0x18e   :  { %832 = vst [vmem:[#allocation1 + $0x6] ss:$9 sm:$0xff] %v626_v22  ;;  %534 = vadd.xlane.f32.xlu0 %v533_v27  ;;  %v628_v28 = vperm.slane %v571_v26, 0  ;;  %v629_v29 = vperm.slane %v571_v26, 1  ;;  %v630_v30 = vperm.slane %v571_v26, 2  ;;  %v631_v37 = vperm.slane %v571_v26, 3  ;;  %v407_v39 = vpop.f32.mrf.mxu2 }
 0x18f   :  { %834 = vst [vmem:[#allocation1 + $0x7] ss:$9 sm:$0xff] %v627_v24  ;;  %v632_v15 = vperm.slane %v571_v26, 4  ;;  %v633_v32 = vperm.slane %v571_v26, 5  ;;  %v634_v33 = vperm.slane %v571_v26, 6  ;;  %v635_v34 = vperm.slane %v571_v26, 7 }
 0x190   :  { %v408_v56 = vadd.f32 %v1579_v36, %v407_v39 }
 0x192   :  { %v450_v0 = vmax.f32 %v408_v56, 0.0 }
 0x193   :  { %v496_v35 = vpop.xlane.xlu1 %495 }
 0x194   :  { %v572_v38 = vadd.f32 %v1654_v9, %v496_v35  ;;  %v479_v61 = vmul.f32 %v1585_v41, %v450_v0 }
 0x196   :  { %v835_v31 = vld [vmem:[#allocation1] sm:$0xff]  ;;  %v636_v40 = vperm.slane %v572_v38, 0  ;;  %v637_v42 = vperm.slane %v572_v38, 1  ;;  %v638_v43 = vperm.slane %v572_v38, 2  ;;  %v639_v45 = vperm.slane %v572_v38, 3  ;;  %v410_v51 = vpop.f32.mrf.mxu2 }
 0x197   :  { %836 = vst [vmem:[#allocation1] ss:$9 sm:$0xff] %v628_v28  ;;  %1053 = vperm.xlu1 %1304, %v835_v31   ;;  %v640_v46 = vperm.slane %v572_v38, 4  ;;  %v641_v47 = vperm.slane %v572_v38, 5  ;;  %v642_v48 = vperm.slane %v572_v38, 6  ;;  %v643_v49 = vperm.slane %v572_v38, 7 }
 0x198   :  { %837 = vst [vmem:[#allocation1 + $0x1] ss:$9 sm:$0xff] %v629_v29  ;;  %v536_v8 = vsel %vm266_vm1, %v479_v61, 0.0  ;;  %v411_v12 = vadd.f32 %v1579_v36, %v410_v51 }
 0x199   :  { %838 = vst [vmem:[#allocation1 + $0x2] ss:$9 sm:$0xff] %v630_v30 }
 0x19a   :  { %839 = vst [vmem:[#allocation1 + $0x3] ss:$9 sm:$0xff] %v631_v37  ;;  %v451_v19 = vmax.f32 %v411_v12, 0.0 }
 0x19b   :  { %840 = vst [vmem:[#allocation1 + $0x4] ss:$9 sm:$0xff] %v632_v15  ;;  %v499_v50 = vpop.xlane.xlu2 %498 }
 0x19c   :  { %841 = vst [vmem:[#allocation1 + $0x5] ss:$9 sm:$0xff] %v633_v32  ;;  %v573_v52 = vadd.f32 %v1654_v9, %v499_v50  ;;  %v480_v23 = vmul.f32 %v1585_v41, %v451_v19 }
 0x19d   :  { %842 = vst [vmem:[#allocation1 + $0x6] ss:$9 sm:$0xff] %v634_v33 }
 0x19e   :  { %843 = vst [vmem:[#allocation1 + $0x7] ss:$9 sm:$0xff] %v635_v34  ;;  %v644_v53 = vperm.slane %v573_v52, 0  ;;  %v645_v54 = vperm.slane %v573_v52, 1  ;;  %v646_v55 = vperm.slane %v573_v52, 2  ;;  %v647_v59 = vperm.slane %v573_v52, 3  ;;  %v413_v57 = vpop.f32.mrf.mxu2 }
 0x19f   :  { %v648_v60 = vperm.slane %v573_v52, 4  ;;  %v649_v62 = vperm.slane %v573_v52, 5  ;;  %v650_v63 = vperm.slane %v573_v52, 6  ;;  %v651_v2 = vperm.slane %v573_v52, 7 }
 0x1a0   :  { %v539_v26 = vsel %vm266_vm1, %v480_v23, 0.0  ;;  %v414_v30 = vadd.f32 %v1579_v36, %v413_v57 }
 0x1a2   :  { %v452_v34 = vmax.f32 %v414_v30, 0.0 }
 0x1a3   :  { %v502_v3 = vpop.xlane.xlu2 %501 }
 0x1a4   :  { %v574_v4 = vadd.f32 %v1654_v9, %v502_v3 }
 0x1a5   :  { %v844_v44 = vld [vmem:[#allocation1] sm:$0xff] }
 0x1a6   :  { %845 = vst [vmem:[#allocation1] ss:$9 sm:$0xff] %v636_v40  ;;  %1056 = vperm.xlu2 %1305, %v844_v44   ;;  %v416_v5 = vpop.f32.mrf.mxu2  ;;  %v652_v7 = vperm.slane %v574_v4, 0  ;;  %v653_v10 = vperm.slane %v574_v4, 1  ;;  %v654_v1 = vperm.slane %v574_v4, 2  ;;  %v655_v16 = vperm.slane %v574_v4, 3 }
 0x1a7   :  { %846 = vst [vmem:[#allocation1 + $0x1] ss:$9 sm:$0xff] %v637_v42  ;;  %v417_v13 = vadd.f32 %v1579_v36, %v416_v5  ;;  %v656_v17 = vperm.slane %v574_v4, 4  ;;  %v657_v18 = vperm.slane %v574_v4, 5  ;;  %v658_v6 = vperm.slane %v574_v4, 6 }
 0x1a8   :  { %847 = vst [vmem:[#allocation1 + $0x2] ss:$9 sm:$0xff] %v638_v43  ;;  %v659_v21 = vperm.slane %v574_v4, 7  ;;  %v481_v40 = vmul.f32 %v1585_v41, %v452_v34 }
 0x1a9   :  { %848 = vst [vmem:[#allocation1 + $0x3] ss:$9 sm:$0xff] %v639_v45  ;;  %v453_v20 = vmax.f32 %v417_v13, 0.0 }
 0x1aa   :  { %849 = vst [vmem:[#allocation1 + $0x4] ss:$9 sm:$0xff] %v640_v46  ;;  %v542_v43 = vsel %vm266_vm1, %v481_v40, 0.0 }
 0x1ab   :  { %850 = vst [vmem:[#allocation1 + $0x5] ss:$9 sm:$0xff] %v641_v47  ;;  %v505_v22 = vpop.xlane.xlu1 %504  ;;  %v482_v24 = vmul.f32 %v1585_v41, %v453_v20 }
 0x1ac   :  { %851 = vst [vmem:[#allocation1 + $0x6] ss:$9 sm:$0xff] %v642_v48  ;;  %v575_v25 = vadd.f32 %v1654_v9, %v505_v22 }
 0x1ad   :  { %852 = vst [vmem:[#allocation1 + $0x7] ss:$9 sm:$0xff] %v643_v49  ;;  %v545_v11 = vsel %vm266_vm1, %v482_v24, 0.0 }
 0x1ae   :  { %v660_v27 = vperm.slane %v575_v25, 0  ;;  %v661_v28 = vperm.slane %v575_v25, 1  ;;  %v662_v29 = vperm.slane %v575_v25, 2  ;;  %v663_v37 = vperm.slane %v575_v25, 3 }
 0x1af   :  { %v664_v15 = vperm.slane %v575_v25, 4  ;;  %v665_v32 = vperm.slane %v575_v25, 5  ;;  %v666_v33 = vperm.slane %v575_v25, 6  ;;  %v667_v35 = vperm.slane %v575_v25, 7 }
 0x1b3   :  { %v508_v38 = vpop.xlane.xlu2 %507 }
 0x1b4   :  { %v853_v58 = vld [vmem:[#allocation1] sm:$0xff]  ;;  %v576_v39 = vadd.f32 %v1654_v9, %v508_v38 }
 0x1b5   :  { %854 = vst [vmem:[#allocation1] ss:$9 sm:$0xff] %v644_v53  ;;  %1059 = vperm.xlu0 %1303, %v853_v58  }
 0x1b6   :  { %855 = vst [vmem:[#allocation1 + $0x1] ss:$9 sm:$0xff] %v645_v54  ;;  %v668_v42 = vperm.slane %v576_v39, 0  ;;  %v669_v44 = vperm.slane %v576_v39, 1  ;;  %v670_v45 = vperm.slane %v576_v39, 2  ;;  %v671_v47 = vperm.slane %v576_v39, 3 }
 0x1b7   :  { %856 = vst [vmem:[#allocation1 + $0x2] ss:$9 sm:$0xff] %v646_v55  ;;  %v672_v48 = vperm.slane %v576_v39, 4  ;;  %v673_v49 = vperm.slane %v576_v39, 5  ;;  %v674_v50 = vperm.slane %v576_v39, 6  ;;  %v675_v51 = vperm.slane %v576_v39, 7  ;;  %v419_v55 = vpop.f32.mrf.mxu2 }
 0x1b8   :  { %857 = vst [vmem:[#allocation1 + $0x3] ss:$9 sm:$0xff] %v647_v59 }
 0x1b9   :  { %858 = vst [vmem:[#allocation1 + $0x4] ss:$9 sm:$0xff] %v648_v60 }
 0x1ba   :  { %859 = vst [vmem:[#allocation1 + $0x5] ss:$9 sm:$0xff] %v649_v62 }
 0x1bb   :  { %860 = vst [vmem:[#allocation1 + $0x6] ss:$9 sm:$0xff] %v650_v63  ;;  %v511_v52 = vpop.xlane.xlu1 %510 }
 0x1bc   :  { %861 = vst [vmem:[#allocation1 + $0x7] ss:$9 sm:$0xff] %v651_v2  ;;  %v577_v53 = vadd.f32 %v1654_v9, %v511_v52 }
 0x1be   :  { %v676_v54 = vperm.slane %v577_v53, 0  ;;  %v677_v56 = vperm.slane %v577_v53, 1  ;;  %v678_v58 = vperm.slane %v577_v53, 2  ;;  %v679_v60 = vperm.slane %v577_v53, 3 }
 0x1bf   :  { %v680_v57 = vperm.slane %v577_v53, 4  ;;  %v681_v62 = vperm.slane %v577_v53, 5  ;;  %v682_v63 = vperm.slane %v577_v53, 6  ;;  %v683_v0 = vperm.slane %v577_v53, 7  ;;  %v422_v3 = vpop.f32.mrf.mxu2 }
 0x1c1   :  { %537 = vadd.xlane.f32.xlu1 %v536_v8 }
 0x1c3   :  { %v1671_v14 = vld [vmem:[#allocation1] sm:$0xff]  ;;  %v514_v2 = vpop.xlane.xlu2 %513 }
 0x1c4   :  { %863 = vst [vmem:[#allocation1] ss:$9 sm:$0xff] %v652_v7  ;;  %v578_v4 = vadd.f32 %v1654_v9, %v514_v2 }
 0x1c5   :  { %864 = vst [vmem:[#allocation1 + $0x1] ss:$9 sm:$0xff] %v653_v10 }
 0x1c6   :  { %865 = vst [vmem:[#allocation1 + $0x2] ss:$9 sm:$0xff] %v654_v1  ;;  %v684_v61 = vperm.slane %v578_v4, 0  ;;  %v685_v5 = vperm.slane %v578_v4, 1  ;;  %v686_v7 = vperm.slane %v578_v4, 2  ;;  %v687_v10 = vperm.slane %v578_v4, 3 }
 0x1c7   :  { %866 = vst [vmem:[#allocation1 + $0x3] ss:$9 sm:$0xff] %v655_v16  ;;  %v688_v12 = vperm.slane %v578_v4, 4  ;;  %v689_v1 = vperm.slane %v578_v4, 5  ;;  %v425_v13 = vpop.f32.mrf.mxu2  ;;  %v420_v16 = vadd.f32 %v1579_v36, %v419_v55 }
 0x1c8   :  { %867 = vst [vmem:[#allocation1 + $0x4] ss:$9 sm:$0xff] %v656_v17  ;;  %v691_v17 = vperm.slane %v578_v4, 7  ;;  %v426_v19 = vadd.f32 %v1579_v36, %v425_v13 }
 0x1c9   :  { %868 = vst [vmem:[#allocation1 + $0x5] ss:$9 sm:$0xff] %v657_v18  ;;  %546 = vadd.xlane.f32.xlu1 %v545_v11 }
 0x1ca   :  { %869 = vst [vmem:[#allocation1 + $0x6] ss:$9 sm:$0xff] %v658_v6  ;;  %v454_v6 = vmax.f32 %v420_v16, 0.0 }
 0x1cb   :  { %870 = vst [vmem:[#allocation1 + $0x7] ss:$9 sm:$0xff] %v659_v21  ;;  %v517_v18 = vpop.xlane.xlu1 %516  ;;  %v456_v21 = vmax.f32 %v426_v19, 0.0 }
 0x1cc   :  { %v579_v20 = vadd.f32 %v1654_v9, %v517_v18  ;;  %v483_v23 = vmul.f32 %v1585_v41, %v454_v6 }
 0x1cd   :  { %v485_v11 = vmul.f32 %v1585_v41, %v456_v21 }
 0x1ce   :  { %v692_v22 = vperm.slane %v579_v20, 0  ;;  %v693_v24 = vperm.slane %v579_v20, 1  ;;  %v694_v25 = vperm.slane %v579_v20, 2 }
 0x1cf   :  { %540 = vadd.xlane.f32.xlu2 %v539_v26  ;;  %v554_v30 = vsel %vm266_vm1, %v485_v11, 0.0 }
 0x1d2   :  { %v871_v31 = vld [vmem:[#allocation1] sm:$0xff] }
 0x1d3   :  { %872 = vst [vmem:[#allocation1] ss:$9 sm:$0xff] %v660_v27  ;;  %v695_v27 = vperm.slane %v579_v20, 3 }
 0x1d4   :  { %873 = vst [vmem:[#allocation1 + $0x1] ss:$9 sm:$0xff] %v661_v28  ;;  %v696_v28 = vperm.slane %v579_v20, 4 }
 0x1d5   :  { %874 = vst [vmem:[#allocation1 + $0x2] ss:$9 sm:$0xff] %v662_v29  ;;  %v548_v29 = vsel %vm266_vm1, %v483_v23, 0.0 }
 0x1d6   :  { %875 = vst [vmem:[#allocation1 + $0x3] ss:$9 sm:$0xff] %v663_v37  ;;  %v697_v37 = vperm.slane %v579_v20, 5 }
 0x1d7   :  { %876 = vst [vmem:[#allocation1 + $0x4] ss:$9 sm:$0xff] %v664_v15  ;;  %v698_v15 = vperm.slane %v579_v20, 6 }
 0x1d8   :  { %877 = vst [vmem:[#allocation1 + $0x5] ss:$9 sm:$0xff] %v665_v32  ;;  %v699_v32 = vperm.slane %v579_v20, 7  ;;  %v1127_v20 = vlaneseq }
 0x1d9   :  { %878 = vst [vmem:[#allocation1 + $0x6] ss:$9 sm:$0xff] %v666_v33  ;;  %v520_v33 = vpop.xlane.xlu2 %519 }
 0x1da   :  { %879 = vst [vmem:[#allocation1 + $0x7] ss:$9 sm:$0xff] %v667_v35  ;;  %v580_v35 = vadd.f32 %v1654_v9, %v520_v33  ;;  %v1711_v11 = vand.u32 127, %v1127_v20 }
 0x1dc   :  { %v700_v39 = vperm.slane %v580_v35, 0  ;;  %v701_v40 = vperm.slane %v580_v35, 1 }
 0x1df   :  { %543 = vadd.xlane.f32.xlu0 %v542_v43  ;;  %v1708_v16 = vpop.xlane.xlu0 %561 }
 0x1e1   :  { %v880_v46 = vld [vmem:[#allocation1] sm:$0xff] }
 0x1e2   :  { %881 = vst [vmem:[#allocation1] ss:$9 sm:$0xff] %v668_v42  ;;  %1068 = vperm.xlu1 %1304, %v880_v46   ;;  %v702_v42 = vperm.slane %v580_v35, 2  ;;  %v704_v46 = vperm.slane %v580_v35, 4 }
 0x1e3   :  { %882 = vst [vmem:[#allocation1 + $0x1] ss:$9 sm:$0xff] %v669_v44 }
 0x1e4   :  { %883 = vst [vmem:[#allocation1 + $0x2] ss:$9 sm:$0xff] %v670_v45  ;;  %v703_v45 = vperm.slane %v580_v35, 3 }
 0x1e5   :  { %884 = vst [vmem:[#allocation1 + $0x3] ss:$9 sm:$0xff] %v671_v47  ;;  %v705_v47 = vperm.slane %v580_v35, 5 }
 0x1e6   :  { %885 = vst [vmem:[#allocation1 + $0x4] ss:$9 sm:$0xff] %v672_v48  ;;  %v706_v48 = vperm.slane %v580_v35, 6 }
 0x1e7   :  { %886 = vst [vmem:[#allocation1 + $0x5] ss:$9 sm:$0xff] %v673_v49  ;;  %1065 = vperm.xlu2 %1305, %v871_v31   ;;  %v423_v31 = vadd.f32 %v1579_v36, %v422_v3  ;;  %v707_v49 = vperm.slane %v580_v35, 7 }
 0x1e8   :  { %887 = vst [vmem:[#allocation1 + $0x6] ss:$9 sm:$0xff] %v674_v50  ;;  %v523_v50 = vpop.xlane.xlu1 %522 }
 0x1e9   :  { %888 = vst [vmem:[#allocation1 + $0x7] ss:$9 sm:$0xff] %v675_v51  ;;  %v455_v34 = vmax.f32 %v423_v31, 0.0  ;;  %v581_v51 = vadd.f32 %v1654_v9, %v523_v50 }
 0x1eb   :  { %v484_v38 = vmul.f32 %v1585_v41, %v455_v34  ;;  %v708_v52 = vperm.slane %v581_v51, 0  ;;  %v709_v53 = vperm.slane %v581_v51, 1 }
 0x1ed   :  { %v551_v43 = vsel %vm266_vm1, %v484_v38, 0.0  ;;  %v1723_v38 = vadd.s32 4294967280, %v1711_v11 }
 0x1f0   :  { %v1683_v59 = vld [vmem:[#allocation1] sm:$0xff] }
 0x1f1   :  { %890 = vst [vmem:[#allocation1] ss:$9 sm:$0xff] %v676_v54  ;;  %v710_v54 = vperm.slane %v581_v51, 2 }
 0x1f2   :  { %891 = vst [vmem:[#allocation1 + $0x1] ss:$9 sm:$0xff] %v677_v56  ;;  %v711_v56 = vperm.slane %v581_v51, 3 }
 0x1f3   :  { %892 = vst [vmem:[#allocation1 + $0x2] ss:$9 sm:$0xff] %v678_v58  ;;  %1062 = vperm.xlu0 %1303, %v1671_v14   ;;  %v690_v14 = vperm.slane %v578_v4, 6  ;;  %v712_v58 = vperm.slane %v581_v51, 4 }
 0x1f4   :  { %893 = vst [vmem:[#allocation1 + $0x3] ss:$9 sm:$0xff] %v679_v60  ;;  %v713_v60 = vperm.slane %v581_v51, 5 }
 0x1f5   :  { %894 = vst [vmem:[#allocation1 + $0x4] ss:$9 sm:$0xff] %v680_v57  ;;  %v714_v57 = vperm.slane %v581_v51, 6 }
 0x1f6   :  { %895 = vst [vmem:[#allocation1 + $0x5] ss:$9 sm:$0xff] %v681_v62  ;;  %v715_v62 = vperm.slane %v581_v51, 7 }
 0x1f7   :  { %896 = vst [vmem:[#allocation1 + $0x6] ss:$9 sm:$0xff] %v682_v63  ;;  %v526_v63 = vpop.xlane.xlu2 %525 }
 0x1f8   :  { %897 = vst [vmem:[#allocation1 + $0x7] ss:$9 sm:$0xff] %v683_v0  ;;  %v582_v0 = vadd.f32 %v1654_v9, %v526_v63 }
 0x1fa   :  { %v716_v2 = vperm.slane %v582_v0, 0  ;;  %v717_v3 = vperm.slane %v582_v0, 1  ;;  %v718_v4 = vperm.slane %v582_v0, 2 }
 0x1ff   :  { %v1687_v8 = vld [vmem:[#allocation1] sm:$0xff]  ;;  %v532_v18 = vpop.xlane.xlu2 %531 }
 0x200   :  { %899 = vst [vmem:[#allocation1] ss:$9 sm:$0xff] %v684_v61 }
 0x201   :  { %900 = vst [vmem:[#allocation1 + $0x1] ss:$9 sm:$0xff] %v685_v5  ;;  %v719_v5 = vperm.slane %v582_v0, 3 }
 0x202   :  { %901 = vst [vmem:[#allocation1 + $0x2] ss:$9 sm:$0xff] %v686_v7  ;;  %v720_v7 = vperm.slane %v582_v0, 4 }
 0x203   :  { %902 = vst [vmem:[#allocation1 + $0x3] ss:$9 sm:$0xff] %v687_v10  ;;  %v722_v10 = vperm.slane %v582_v0, 6 }
 0x204   :  { %903 = vst [vmem:[#allocation1 + $0x4] ss:$9 sm:$0xff] %v688_v12  ;;  %v723_v12 = vperm.slane %v582_v0, 7 }
 0x205   :  { %904 = vst [vmem:[#allocation1 + $0x5] ss:$9 sm:$0xff] %v689_v1  ;;  %v428_v1 = vpop.f32.mrf.mxu2 }
 0x206   :  { %905 = vst [vmem:[#allocation1 + $0x6] ss:$9 sm:$0xff] %v690_v14  ;;  %v429_v14 = vadd.f32 %v1579_v36, %v428_v1 }
 0x207   :  { %906 = vst [vmem:[#allocation1 + $0x7] ss:$9 sm:$0xff] %v691_v17  ;;  %v1057_v31 = vpop.permute.xlu2 %1056 }
 0x208   :  { %v457_v19 = vmax.f32 %v429_v14, 0.0 }
 0x20a   :  { %v486_v36 = vmul.f32 %v1585_v41, %v457_v19 }
 0x20c   :  { %555 = vadd.xlane.f32.xlu1 %v554_v30  ;;  %v557_v30 = vsel %vm266_vm1, %v486_v36, 0.0  ;;  %v1737_v36 = vadd.s32 4294967264, %v1711_v11  ;;  %vm1208_vm1 = vcmask 1040384  }
 0x20e   :  { %v907_v26 = vld [vmem:[#allocation1] sm:$0xff] }
 0x20f   :  { %908 = vst [vmem:[#allocation1] ss:$9 sm:$0xff] %v692_v22 }
 0x210   :  { %909 = vst [vmem:[#allocation1 + $0x1] ss:$9 sm:$0xff] %v693_v24  ;;  %549 = vadd.xlane.f32.xlu2 %v548_v29  ;;  %v1715_v29 = vadd.s32 4294967288, %v1711_v11 }
 0x211   :  { %910 = vst [vmem:[#allocation1 + $0x2] ss:$9 sm:$0xff] %v694_v25 }
 0x212   :  { %911 = vst [vmem:[#allocation1 + $0x3] ss:$9 sm:$0xff] %v695_v27  ;;  %v1131_v41 = vperm.slane %v1057_v31, %v1715_v29 }
 0x213   :  { %912 = vst [vmem:[#allocation1 + $0x4] ss:$9 sm:$0xff] %v696_v28  ;;  %v535_v28 = vpop.xlane.xlu0 %534 }
 0x214   :  { %913 = vst [vmem:[#allocation1 + $0x5] ss:$9 sm:$0xff] %v697_v37  ;;  %v584_v37 = vadd.f32 %v1654_v9, %v532_v18  ;;  %v585_v50 = vadd.f32 %v1654_v9, %v535_v28 }
 0x215   :  { %914 = vst [vmem:[#allocation1 + $0x6] ss:$9 sm:$0xff] %v698_v15 }
 0x216   :  { %915 = vst [vmem:[#allocation1 + $0x7] ss:$9 sm:$0xff] %v699_v32  ;;  %v732_v33 = vperm.slane %v584_v37, 0  ;;  %v733_v35 = vperm.slane %v584_v37, 1  ;;  %v740_v51 = vperm.slane %v585_v50, 0 }
 0x21d   :  { %v916_v44 = vld [vmem:[#allocation1] sm:$0xff]  ;;  %552 = vadd.xlane.f32.xlu0 %v551_v43  ;;  %v735_v43 = vperm.slane %v584_v37, 3 }
 0x21e   :  { %917 = vst [vmem:[#allocation1] ss:$9 sm:$0xff] %v700_v39 }
 0x21f   :  { %918 = vst [vmem:[#allocation1 + $0x1] ss:$9 sm:$0xff] %v701_v40  ;;  %v734_v40 = vperm.slane %v584_v37, 2 }
 0x220   :  { %919 = vst [vmem:[#allocation1 + $0x2] ss:$9 sm:$0xff] %v702_v42 }
 0x221   :  { %920 = vst [vmem:[#allocation1 + $0x3] ss:$9 sm:$0xff] %v703_v45  ;;  %v736_v45 = vperm.slane %v584_v37, 4 }
 0x222   :  { %921 = vst [vmem:[#allocation1 + $0x4] ss:$9 sm:$0xff] %v704_v46  ;;  %v737_v46 = vperm.slane %v584_v37, 5 }
 0x223   :  { %922 = vst [vmem:[#allocation1 + $0x5] ss:$9 sm:$0xff] %v705_v47 }
 0x224   :  { %923 = vst [vmem:[#allocation1 + $0x6] ss:$9 sm:$0xff] %v706_v48  ;;  %v738_v48 = vperm.slane %v584_v37, 6 }
 0x225   :  { %924 = vst [vmem:[#allocation1 + $0x7] ss:$9 sm:$0xff] %v707_v49  ;;  %1077 = vperm.xlu1 %1304, %v907_v26   ;;  %v739_v49 = vperm.slane %v584_v37, 7 }
 0x227   :  { %v1060_v39 = vpop.permute.xlu0 %1059 }
 0x228   :  { %1074 = vperm.xlu2 %1305, %v1687_v8   ;;  %v721_v8 = vperm.slane %v582_v0, 5 }
 0x22c   :  { %v1702_v55 = vld [vmem:[#allocation1] sm:$0xff] }
 0x22d   :  { %926 = vst [vmem:[#allocation1] ss:$9 sm:$0xff] %v708_v52  ;;  %v741_v52 = vperm.slane %v585_v50, 1 }
 0x22e   :  { %927 = vst [vmem:[#allocation1 + $0x1] ss:$9 sm:$0xff] %v709_v53  ;;  %v742_v53 = vperm.slane %v585_v50, 2 }
 0x22f   :  { %928 = vst [vmem:[#allocation1 + $0x2] ss:$9 sm:$0xff] %v710_v54 }
 0x230   :  { %929 = vst [vmem:[#allocation1 + $0x3] ss:$9 sm:$0xff] %v711_v56  ;;  %v743_v56 = vperm.slane %v585_v50, 3 }
 0x231   :  { %930 = vst [vmem:[#allocation1 + $0x4] ss:$9 sm:$0xff] %v712_v58  ;;  %1071 = vperm.xlu0 %1303, %v1683_v59   ;;  %v529_v59 = vpop.xlane.xlu1 %528  ;;  %v744_v58 = vperm.slane %v585_v50, 4 }
 0x232   :  { %931 = vst [vmem:[#allocation1 + $0x5] ss:$9 sm:$0xff] %v713_v60  ;;  %v583_v13 = vadd.f32 %v1654_v9, %v529_v59  ;;  %v745_v60 = vperm.slane %v585_v50, 5 }
 0x233   :  { %932 = vst [vmem:[#allocation1 + $0x6] ss:$9 sm:$0xff] %v714_v57  ;;  %v746_v57 = vperm.slane %v585_v50, 6 }
 0x234   :  { %933 = vst [vmem:[#allocation1 + $0x7] ss:$9 sm:$0xff] %v715_v62  ;;  %v724_v17 = vperm.slane %v583_v13, 0  ;;  %v725_v6 = vperm.slane %v583_v13, 1  ;;  %v726_v21 = vperm.slane %v583_v13, 2  ;;  %v727_v23 = vperm.slane %v583_v13, 3 }
 0x235   :  { %v728_v24 = vperm.slane %v583_v13, 4  ;;  %v729_v25 = vperm.slane %v583_v13, 5  ;;  %v730_v26 = vperm.slane %v583_v13, 6  ;;  %v731_v27 = vperm.slane %v583_v13, 7 }
 0x236   :  { %v747_v62 = vperm.slane %v585_v50, 7 }
 0x239   :  { %1080 = vperm.xlu0 %1303, %v916_v44   ;;  %v1054_v15 = vpop.permute.xlu1 %1053  ;;  %v1135_v44 = vperm.slane %v1060_v39, %v1723_v38 }
 0x23a   :  { %v1129_v32 = vperm.slane %v1054_v15, %v1711_v11 }
 0x23b   :  { %v934_v61 = vld [vmem:[#allocation1] sm:$0xff] }
 0x23c   :  { %935 = vst [vmem:[#allocation1] ss:$9 sm:$0xff] %v716_v2  ;;  %1086 = vperm.xlu1 %1304, %v934_v61   ;;  %v1133_v34 = vsel %vm1132_vm2, %v1131_v41, %v1129_v32 }
 0x23d   :  { %936 = vst [vmem:[#allocation1 + $0x1] ss:$9 sm:$0xff] %v717_v3  ;;  %v1727_v47 = vsel %vm1136_vm3, %v1135_v44, %v1133_v34 }
 0x23e   :  { %937 = vst [vmem:[#allocation1 + $0x2] ss:$9 sm:$0xff] %v718_v4 }
 0x23f   :  { %938 = vst [vmem:[#allocation1 + $0x3] ss:$9 sm:$0xff] %v719_v5 }
 0x240   :  { %939 = vst [vmem:[#allocation1 + $0x4] ss:$9 sm:$0xff] %v720_v7 }
 0x241   :  { %940 = vst [vmem:[#allocation1 + $0x5] ss:$9 sm:$0xff] %v721_v8  ;;  %v538_v63 = vpop.xlane.xlu1 %537 }
 0x242   :  { %941 = vst [vmem:[#allocation1 + $0x6] ss:$9 sm:$0xff] %v722_v10  ;;  %v586_v0 = vadd.f32 %v1654_v9, %v538_v63 }
 0x243   :  { %942 = vst [vmem:[#allocation1 + $0x7] ss:$9 sm:$0xff] %v723_v12  ;;  %v541_v12 = vpop.xlane.xlu2 %540 }
 0x244   :  { %v748_v2 = vperm.slane %v586_v0, 0  ;;  %v749_v3 = vperm.slane %v586_v0, 1  ;;  %v750_v4 = vperm.slane %v586_v0, 2  ;;  %v752_v5 = vperm.slane %v586_v0, 4 }
 0x245   :  { %v753_v7 = vperm.slane %v586_v0, 5  ;;  %v754_v8 = vperm.slane %v586_v0, 6  ;;  %v755_v10 = vperm.slane %v586_v0, 7  ;;  %v587_v59 = vadd.f32 %v1654_v9, %v541_v12 }
 0x246   :  { %v1755_v12 = vadd.s32 4294967240, %v1711_v11 }
 0x247   :  { %v756_v1 = vperm.slane %v587_v59, 0  ;;  %v757_v14 = vperm.slane %v587_v59, 1  ;;  %v759_v18 = vperm.slane %v587_v59, 3  ;;  %v760_v19 = vperm.slane %v587_v59, 4 }
 0x24a   :  { %v943_v22 = vld [vmem:[#allocation1] sm:$0xff] }
 0x24b   :  { %944 = vst [vmem:[#allocation1] ss:$9 sm:$0xff] %v724_v17  ;;  %1089 = vperm.xlu0 %1303, %v943_v22   ;;  %v758_v17 = vperm.slane %v587_v59, 2  ;;  %v547_v22 = vpop.xlane.xlu1 %546 }
 0x24c   :  { %945 = vst [vmem:[#allocation1 + $0x1] ss:$9 sm:$0xff] %v725_v6  ;;  %v761_v6 = vperm.slane %v587_v59, 5 }
 0x24d   :  { %946 = vst [vmem:[#allocation1 + $0x2] ss:$9 sm:$0xff] %v726_v21  ;;  %v762_v21 = vperm.slane %v587_v59, 6 }
 0x24e   :  { %947 = vst [vmem:[#allocation1 + $0x3] ss:$9 sm:$0xff] %v727_v23 }
 0x24f   :  { %948 = vst [vmem:[#allocation1 + $0x4] ss:$9 sm:$0xff] %v728_v24  ;;  %v763_v24 = vperm.slane %v587_v59, 7 }
 0x250   :  { %949 = vst [vmem:[#allocation1 + $0x5] ss:$9 sm:$0xff] %v729_v25 }
 0x251   :  { %950 = vst [vmem:[#allocation1 + $0x6] ss:$9 sm:$0xff] %v730_v26  ;;  %558 = vadd.xlane.f32.xlu2 %v557_v30  ;;  %v1066_v26 = vpop.permute.xlu2 %1065  ;;  %v1743_v30 = vadd.s32 4294967256, %v1711_v11 }
 0x252   :  { %951 = vst [vmem:[#allocation1 + $0x7] ss:$9 sm:$0xff] %v731_v27  ;;  %v544_v23 = vpop.xlane.xlu0 %543  ;;  %v1740_v27 = vadd.s32 4294967272, %v1711_v11 }
 0x253   :  { %v588_v25 = vadd.f32 %v1654_v9, %v544_v23 }
 0x254   :  { %v1069_v31 = vpop.permute.xlu1 %1068 }
 0x255   :  { %v764_v37 = vperm.slane %v588_v25, 0  ;;  %v765_v41 = vperm.slane %v588_v25, 1  ;;  %v766_v34 = vperm.slane %v588_v25, 2  ;;  %v767_v39 = vperm.slane %v588_v25, 3 }
 0x256   :  { %v769_v44 = vperm.slane %v588_v25, 5 }
 0x259   :  { %v952_v42 = vld [vmem:[#allocation1] sm:$0xff] }
 0x25a   :  { %953 = vst [vmem:[#allocation1] ss:$9 sm:$0xff] %v732_v33  ;;  %v1147_v33 = vperm.slane %v1069_v31, %v1743_v30 }
 0x25b   :  { %954 = vst [vmem:[#allocation1 + $0x1] ss:$9 sm:$0xff] %v733_v35  ;;  %v1143_v35 = vperm.slane %v1066_v26, %v1737_v36 }
 0x25c   :  { %955 = vst [vmem:[#allocation1 + $0x2] ss:$9 sm:$0xff] %v734_v40 }
 0x25d   :  { %956 = vst [vmem:[#allocation1 + $0x3] ss:$9 sm:$0xff] %v735_v43 }
 0x25e   :  { %957 = vst [vmem:[#allocation1 + $0x4] ss:$9 sm:$0xff] %v736_v45 }
 0x25f   :  { %958 = vst [vmem:[#allocation1 + $0x5] ss:$9 sm:$0xff] %v737_v46  ;;  %v770_v46 = vperm.slane %v588_v25, 6 }
 0x260   :  { %959 = vst [vmem:[#allocation1 + $0x6] ss:$9 sm:$0xff] %v738_v48  ;;  %v771_v48 = vperm.slane %v588_v25, 7 }
 0x261   :  { %960 = vst [vmem:[#allocation1 + $0x7] ss:$9 sm:$0xff] %v739_v49  ;;  %v589_v49 = vadd.f32 %v1654_v9, %v547_v22 }
 0x263   :  { %v772_v50 = vperm.slane %v589_v49, 0 }
 0x265   :  { %v1063_v28 = vpop.permute.xlu0 %1062 }
 0x266   :  { %v1139_v32 = vperm.slane %v1063_v28, %v1740_v27 }
 0x268   :  { %v961_v54 = vld [vmem:[#allocation1] sm:$0xff]  ;;  %v1141_v40 = vsel %vm1140_vm4, %v1139_v32, %v1727_v47  ;;  %v774_v47 = vperm.slane %v589_v49, 2 }
 0x269   :  { %962 = vst [vmem:[#allocation1] ss:$9 sm:$0xff] %v740_v51  ;;  %1095 = vperm.xlu1 %1304, %v961_v54   ;;  %1083 = vperm.xlu2 %1305, %v1702_v55   ;;  %v751_v55 = vperm.slane %v586_v0, 3  ;;  %v1145_v43 = vsel %vm1144_vm5, %v1143_v35, %v1141_v40  ;;  %v773_v51 = vperm.slane %v589_v49, 1  ;;  %v776_v54 = vperm.slane %v589_v49, 4 }
 0x26a   :  { %963 = vst [vmem:[#allocation1 + $0x1] ss:$9 sm:$0xff] %v741_v52  ;;  %v1149_v45 = vsel %vm1148_vm6, %v1147_v33, %v1145_v43 }
 0x26b   :  { %964 = vst [vmem:[#allocation1 + $0x2] ss:$9 sm:$0xff] %v742_v53  ;;  %v775_v53 = vperm.slane %v589_v49, 3 }
 0x26c   :  { %965 = vst [vmem:[#allocation1 + $0x3] ss:$9 sm:$0xff] %v743_v56  ;;  %v777_v56 = vperm.slane %v589_v49, 5 }
 0x26d   :  { %966 = vst [vmem:[#allocation1 + $0x4] ss:$9 sm:$0xff] %v744_v58  ;;  %v778_v58 = vperm.slane %v589_v49, 6 }
 0x26e   :  { %967 = vst [vmem:[#allocation1 + $0x5] ss:$9 sm:$0xff] %v745_v60 }
 0x26f   :  { %968 = vst [vmem:[#allocation1 + $0x6] ss:$9 sm:$0xff] %v746_v57  ;;  %v779_v57 = vperm.slane %v589_v49, 7 }
 0x270   :  { %969 = vst [vmem:[#allocation1 + $0x7] ss:$9 sm:$0xff] %v747_v62 }
 0x271   :  { %1092 = vperm.xlu2 %1305, %v952_v42   ;;  %v768_v42 = vperm.slane %v588_v25, 4 }
 0x277   :  { %v1732_v61 = vld [vmem:[#allocation1] sm:$0xff] }
 0x278   :  { %971 = vst [vmem:[#allocation1] ss:$9 sm:$0xff] %v748_v2 }
 0x279   :  { %972 = vst [vmem:[#allocation1 + $0x1] ss:$9 sm:$0xff] %v749_v3 }
 0x27a   :  { %973 = vst [vmem:[#allocation1 + $0x2] ss:$9 sm:$0xff] %v750_v4 }
 0x27b   :  { %974 = vst [vmem:[#allocation1 + $0x3] ss:$9 sm:$0xff] %v751_v55 }
 0x27c   :  { %975 = vst [vmem:[#allocation1 + $0x4] ss:$9 sm:$0xff] %v752_v5 }
 0x27d   :  { %976 = vst [vmem:[#allocation1 + $0x5] ss:$9 sm:$0xff] %v753_v7 }
 0x27e   :  { %977 = vst [vmem:[#allocation1 + $0x6] ss:$9 sm:$0xff] %v754_v8 }
 0x27f   :  { %978 = vst [vmem:[#allocation1 + $0x7] ss:$9 sm:$0xff] %v755_v10 }
 0x283   :  { %v550_v60 = vpop.xlane.xlu2 %549 }
 0x284   :  { %v590_v62 = vadd.f32 %v1654_v9, %v550_v60 }
 0x286   :  { %v979_v13 = vld [vmem:[#allocation1] sm:$0xff]  ;;  %v780_v63 = vperm.slane %v590_v62, 0  ;;  %v781_v0 = vperm.slane %v590_v62, 1  ;;  %v782_v3 = vperm.slane %v590_v62, 2  ;;  %v783_v55 = vperm.slane %v590_v62, 3 }
 0x287   :  { %980 = vst [vmem:[#allocation1] ss:$9 sm:$0xff] %v756_v1  ;;  %1101 = vperm.xlu0 %1303, %v979_v13   ;;  %v784_v5 = vperm.slane %v590_v62, 4  ;;  %v785_v7 = vperm.slane %v590_v62, 5  ;;  %v786_v8 = vperm.slane %v590_v62, 6  ;;  %v787_v10 = vperm.slane %v590_v62, 7 }
 0x288   :  { %981 = vst [vmem:[#allocation1 + $0x1] ss:$9 sm:$0xff] %v757_v14  ;;  %v1758_v1 = vadd.s32 4294967248, %v1711_v11 }
 0x289   :  { %982 = vst [vmem:[#allocation1 + $0x2] ss:$9 sm:$0xff] %v758_v17 }
 0x28a   :  { %983 = vst [vmem:[#allocation1 + $0x3] ss:$9 sm:$0xff] %v759_v18 }
 0x28b   :  { %984 = vst [vmem:[#allocation1 + $0x4] ss:$9 sm:$0xff] %v760_v19  ;;  %v1075_v59 = vpop.permute.xlu2 %1074 }
 0x28c   :  { %985 = vst [vmem:[#allocation1 + $0x5] ss:$9 sm:$0xff] %v761_v6  ;;  %v1155_v17 = vperm.slane %v1075_v59, %v1755_v12 }
 0x28d   :  { %986 = vst [vmem:[#allocation1 + $0x6] ss:$9 sm:$0xff] %v762_v21 }
 0x28e   :  { %987 = vst [vmem:[#allocation1 + $0x7] ss:$9 sm:$0xff] %v763_v24 }
 0x290   :  { %v553_v2 = vpop.xlane.xlu0 %552 }
 0x291   :  { %v591_v18 = vadd.f32 %v1654_v9, %v553_v2 }
 0x293   :  { %v788_v21 = vperm.slane %v591_v18, 0  ;;  %v789_v22 = vperm.slane %v591_v18, 1  ;;  %v790_v24 = vperm.slane %v591_v18, 2  ;;  %v791_v25 = vperm.slane %v591_v18, 3 }
 0x294   :  { %v792_v26 = vperm.slane %v591_v18, 4  ;;  %v793_v28 = vperm.slane %v591_v18, 5  ;;  %v794_v31 = vperm.slane %v591_v18, 6 }
 0x295   :  { %v988_v15 = vld [vmem:[#allocation1] sm:$0xff] }
 0x296   :  { %989 = vst [vmem:[#allocation1] ss:$9 sm:$0xff] %v764_v37  ;;  %1104 = vperm.xlu2 %1305, %v988_v15   ;;  %v795_v37 = vperm.slane %v591_v18, 7  ;;  %v556_v15 = vpop.xlane.xlu1 %555 }
 0x297   :  { %990 = vst [vmem:[#allocation1 + $0x1] ss:$9 sm:$0xff] %v765_v41  ;;  %v592_v41 = vadd.f32 %v1654_v9, %v556_v15  ;;  %v1170_v15 = vadd.s32 4294967208, %v1711_v11 }
 0x298   :  { %991 = vst [vmem:[#allocation1 + $0x2] ss:$9 sm:$0xff] %v766_v34 }
 0x299   :  { %992 = vst [vmem:[#allocation1 + $0x3] ss:$9 sm:$0xff] %v767_v39  ;;  %v796_v32 = vperm.slane %v592_v41, 0  ;;  %v797_v33 = vperm.slane %v592_v41, 1  ;;  %v798_v35 = vperm.slane %v592_v41, 2  ;;  %v799_v39 = vperm.slane %v592_v41, 3 }
 0x29a   :  { %993 = vst [vmem:[#allocation1 + $0x4] ss:$9 sm:$0xff] %v768_v42  ;;  %v800_v40 = vperm.slane %v592_v41, 4  ;;  %v801_v42 = vperm.slane %v592_v41, 5  ;;  %v802_v43 = vperm.slane %v592_v41, 6 }
 0x29b   :  { %994 = vst [vmem:[#allocation1 + $0x5] ss:$9 sm:$0xff] %v769_v44  ;;  %v803_v44 = vperm.slane %v592_v41, 7 }
 0x29c   :  { %995 = vst [vmem:[#allocation1 + $0x6] ss:$9 sm:$0xff] %v770_v46 }
 0x29d   :  { %996 = vst [vmem:[#allocation1 + $0x7] ss:$9 sm:$0xff] %v771_v48 }
 0x2a3   :  { %v1072_v13 = vpop.permute.xlu0 %1071 }
 0x2a4   :  { %v997_v52 = vld [vmem:[#allocation1] sm:$0xff]  ;;  %v1151_v14 = vperm.slane %v1072_v13, %v1758_v1 }
 0x2a5   :  { %998 = vst [vmem:[#allocation1] ss:$9 sm:$0xff] %v772_v50  ;;  %1107 = vperm.xlu1 %1304, %v997_v52  }
 0x2a6   :  { %999 = vst [vmem:[#allocation1 + $0x1] ss:$9 sm:$0xff] %v773_v51  ;;  %v1153_v19 = vsel %vm1152_vm7, %v1151_v14, %v1149_v45 }
 0x2a7   :  { %1000 = vst [vmem:[#allocation1 + $0x2] ss:$9 sm:$0xff] %v774_v47  ;;  %v1765_v6 = vsel %vm1156_vm8, %v1155_v17, %v1153_v19  ;;  %v1158_v17 = vadd.s32 4294967232, %v1711_v11  ;;  %v1162_v19 = vadd.s32 4294967224, %v1711_v11 }
 0x2a8   :  { %1001 = vst [vmem:[#allocation1 + $0x3] ss:$9 sm:$0xff] %v775_v53 }
 0x2a9   :  { %1002 = vst [vmem:[#allocation1 + $0x4] ss:$9 sm:$0xff] %v776_v54 }
 0x2aa   :  { %1003 = vst [vmem:[#allocation1 + $0x5] ss:$9 sm:$0xff] %v777_v56 }
 0x2ab   :  { %1004 = vst [vmem:[#allocation1 + $0x6] ss:$9 sm:$0xff] %v778_v58  ;;  %v594_v58 = vadd.f32 %v1654_v9, %v1708_v16  ;;  %v1078_v16 = vpop.permute.xlu1 %1077 }
 0x2ac   :  { %1005 = vst [vmem:[#allocation1 + $0x7] ss:$9 sm:$0xff] %v779_v57 }
 0x2ad   :  { %v812_v60 = vperm.slane %v594_v58, 0  ;;  %v813_v57 = vperm.slane %v594_v58, 1  ;;  %v816_v2 = vperm.slane %v594_v58, 4 }
 0x2b3   :  { %v1006_v4 = vld [vmem:[#allocation1] sm:$0xff] }
 0x2b4   :  { %1110 = vperm.xlu0 %1303, %v1006_v4   ;;  %1007 = vst [vmem:[#allocation1] ss:$9 sm:$0xff] %v780_v63  ;;  %v814_v63 = vperm.slane %v594_v58, 2  ;;  %v818_v4 = vperm.slane %v594_v58, 6 }
 0x2b5   :  { %1008 = vst [vmem:[#allocation1 + $0x1] ss:$9 sm:$0xff] %v781_v0  ;;  %v815_v0 = vperm.slane %v594_v58, 3 }
 0x2b6   :  { %1009 = vst [vmem:[#allocation1 + $0x2] ss:$9 sm:$0xff] %v782_v3  ;;  %v817_v3 = vperm.slane %v594_v58, 5 }
 0x2b7   :  { %1010 = vst [vmem:[#allocation1 + $0x3] ss:$9 sm:$0xff] %v783_v55  ;;  %v819_v55 = vperm.slane %v594_v58, 7 }
 0x2b8   :  { %1011 = vst [vmem:[#allocation1 + $0x4] ss:$9 sm:$0xff] %v784_v5 }
 0x2b9   :  { %1012 = vst [vmem:[#allocation1 + $0x5] ss:$9 sm:$0xff] %v785_v7 }
 0x2ba   :  { %1013 = vst [vmem:[#allocation1 + $0x6] ss:$9 sm:$0xff] %v786_v8  ;;  %v1087_v8 = vpop.permute.xlu1 %1086 }
 0x2bb   :  { %1014 = vst [vmem:[#allocation1 + $0x7] ss:$9 sm:$0xff] %v787_v10 }
 0x2c2   :  { %v1015_v23 = vld [vmem:[#allocation1] sm:$0xff] }
 0x2c3   :  { %1113 = vperm.xlu2 %1305, %v1015_v23   ;;  %1016 = vst [vmem:[#allocation1] ss:$9 sm:$0xff] %v788_v21  ;;  %v1159_v21 = vperm.slane %v1078_v16, %v1158_v17  ;;  %v1166_v23 = vadd.s32 4294967216, %v1711_v11 }
 0x2c4   :  { %1017 = vst [vmem:[#allocation1 + $0x1] ss:$9 sm:$0xff] %v789_v22  ;;  %v559_v45 = vpop.xlane.xlu2 %558 }
 0x2c5   :  { %1018 = vst [vmem:[#allocation1 + $0x2] ss:$9 sm:$0xff] %v790_v24  ;;  %v593_v46 = vadd.f32 %v1654_v9, %v559_v45  ;;  %v1081_v9 = vpop.permute.xlu0 %1080 }
 0x2c6   :  { %1019 = vst [vmem:[#allocation1 + $0x3] ss:$9 sm:$0xff] %v791_v25  ;;  %v1163_v24 = vperm.slane %v1081_v9, %v1162_v19 }
 0x2c7   :  { %1020 = vst [vmem:[#allocation1 + $0x4] ss:$9 sm:$0xff] %v792_v26  ;;  %v804_v48 = vperm.slane %v593_v46, 0  ;;  %v805_v49 = vperm.slane %v593_v46, 1  ;;  %v806_v50 = vperm.slane %v593_v46, 2  ;;  %v807_v52 = vperm.slane %v593_v46, 3 }
 0x2c8   :  { %1021 = vst [vmem:[#allocation1 + $0x5] ss:$9 sm:$0xff] %v793_v28  ;;  %v808_v47 = vperm.slane %v593_v46, 4  ;;  %v809_v53 = vperm.slane %v593_v46, 5  ;;  %v810_v54 = vperm.slane %v593_v46, 6  ;;  %v811_v56 = vperm.slane %v593_v46, 7 }
 0x2c9   :  { %1022 = vst [vmem:[#allocation1 + $0x6] ss:$9 sm:$0xff] %v794_v31  ;;  %v1161_v26 = vsel %vm1160_vm9, %v1159_v21, %v1765_v6  ;;  %v1174_v6 = vadd.s32 4294967200, %v1711_v11 }
 0x2ca   :  { %1023 = vst [vmem:[#allocation1 + $0x7] ss:$9 sm:$0xff] %v795_v37 }
 0x2cc   :  { %v1084_v5 = vpop.permute.xlu2 %1083 }
 0x2cd   :  { %v1090_v7 = vpop.permute.xlu0 %1089  ;;  %v1167_v28 = vperm.slane %v1084_v5, %v1166_v23 }
 0x2d1   :  { %v1024_v34 = vld [vmem:[#allocation1] sm:$0xff] }
 0x2d2   :  { %1116 = vperm.xlu1 %1304, %v1024_v34   ;;  %1025 = vst [vmem:[#allocation1] ss:$9 sm:$0xff] %v796_v32  ;;  %v1165_v32 = vsel %vm1164_vm10, %v1163_v24, %v1161_v26  ;;  %v1178_v34 = vadd.s32 4294967192, %v1711_v11 }
 0x2d3   :  { %1026 = vst [vmem:[#allocation1 + $0x1] ss:$9 sm:$0xff] %v797_v33  ;;  %v1169_v33 = vsel %vm1168_vm11, %v1167_v28, %v1165_v32 }
 0x2d4   :  { %1027 = vst [vmem:[#allocation1 + $0x2] ss:$9 sm:$0xff] %v798_v35  ;;  %v1093_v10 = vpop.permute.xlu2 %1092 }
 0x2d5   :  { %1028 = vst [vmem:[#allocation1 + $0x3] ss:$9 sm:$0xff] %v799_v39 }
 0x2d6   :  { %1029 = vst [vmem:[#allocation1 + $0x4] ss:$9 sm:$0xff] %v800_v40  ;;  %v1171_v40 = vperm.slane %v1087_v8, %v1170_v15 }
 0x2d7   :  { %1030 = vst [vmem:[#allocation1 + $0x5] ss:$9 sm:$0xff] %v801_v42 }
 0x2d8   :  { %1031 = vst [vmem:[#allocation1 + $0x6] ss:$9 sm:$0xff] %v802_v43 }
 0x2d9   :  { %1032 = vst [vmem:[#allocation1 + $0x7] ss:$9 sm:$0xff] %v803_v44 }
 0x2db   :  { %v1772_v13 = vpop.permute.xlu1 %1095 }
 0x2e0   :  { %v1033_v51 = vld [vmem:[#allocation1] sm:$0xff] }
 0x2e1   :  { %1119 = vperm.xlu0 %1303, %v1033_v51   ;;  %1034 = vst [vmem:[#allocation1] ss:$9 sm:$0xff] %v804_v48  ;;  %v1179_v48 = vperm.slane %v1093_v10, %v1178_v34 }
 0x2e2   :  { %1035 = vst [vmem:[#allocation1 + $0x1] ss:$9 sm:$0xff] %v805_v49 }
 0x2e3   :  { %1036 = vst [vmem:[#allocation1 + $0x2] ss:$9 sm:$0xff] %v806_v50  ;;  %v1175_v50 = vperm.slane %v1090_v7, %v1174_v6 }
 0x2e4   :  { %1037 = vst [vmem:[#allocation1 + $0x3] ss:$9 sm:$0xff] %v807_v52  ;;  %v1186_v52 = vadd.s32 4294967176, %v1711_v11 }
 0x2e5   :  { %1038 = vst [vmem:[#allocation1 + $0x4] ss:$9 sm:$0xff] %v808_v47 }
 0x2e6   :  { %1039 = vst [vmem:[#allocation1 + $0x5] ss:$9 sm:$0xff] %v809_v53 }
 0x2e7   :  { %1040 = vst [vmem:[#allocation1 + $0x6] ss:$9 sm:$0xff] %v810_v54 }
 0x2e8   :  { %1041 = vst [vmem:[#allocation1 + $0x7] ss:$9 sm:$0xff] %v811_v56 }
 0x2e9   :  { %1098 = vperm.xlu0 %1303, %v1732_v61  }
 0x2ef   :  { %v1042_v62 = vld [vmem:[#allocation1] sm:$0xff] }
 0x2f0   :  { %1122 = vperm.xlu2 %1305, %v1042_v62   ;;  %1043 = vst [vmem:[#allocation1] ss:$9 sm:$0xff] %v812_v60  ;;  %v1105_v14 = vpop.permute.xlu2 %1104 }
 0x2f1   :  { %1044 = vst [vmem:[#allocation1 + $0x1] ss:$9 sm:$0xff] %v813_v57  ;;  %v1191_v31 = vperm.slane %v1105_v14, %v1715_v29  ;;  %v1173_v29 = vsel %vm1172_vm12, %v1171_v40, %v1169_v33 }
 0x2f2   :  { %1045 = vst [vmem:[#allocation1 + $0x2] ss:$9 sm:$0xff] %v814_v63  ;;  %v1177_v54 = vsel %vm1176_vm13, %v1175_v50, %v1173_v29 }
 0x2f3   :  { %1046 = vst [vmem:[#allocation1 + $0x3] ss:$9 sm:$0xff] %v815_v0  ;;  %v1181_v56 = vsel %vm1180_vm14, %v1179_v48, %v1177_v54 }
 0x2f4   :  { %1047 = vst [vmem:[#allocation1 + $0x4] ss:$9 sm:$0xff] %v816_v2 }
 0x2f5   :  { %1048 = vst [vmem:[#allocation1 + $0x5] ss:$9 sm:$0xff] %v817_v3 }
 0x2f6   :  { %1049 = vst [vmem:[#allocation1 + $0x6] ss:$9 sm:$0xff] %v818_v4 }
 0x2f7   :  { %1050 = vst [vmem:[#allocation1 + $0x7] ss:$9 sm:$0xff] %v819_v55 }
 0x2f9   :  { %v1102_v59 = vpop.permute.xlu0 %1101 }
 0x2fa   :  { %v1190_v41 = vperm.slane %v1102_v59, %v1711_v11 }
 0x2fc   :  { %v1192_v35 = vsel %vm1132_vm2, %v1191_v31, %v1190_v41  ;;  %vm1213_vm2 = vcmp.lt.s32.totalorder %v1127_v20, 200 }
 0x2fe   :  { %v1051_v61 = vld [vmem:[#allocation1] sm:$0xff] }
 0x2ff   :  { %1125 = vperm.xlu1 %1304, %v1051_v61  }
 0x317   :  { %v1108_v22 = vpop.permute.xlu1 %1107 }
 0x318   :  { %v1193_v42 = vperm.slane %v1108_v22, %v1723_v38  ;;  %v1182_v38 = vadd.s32 4294967184, %v1711_v11 }
 0x31a   :  { %v1194_v43 = vsel %vm1136_vm3, %v1193_v42, %v1192_v35  ;;  %v1183_v62 = vperm.slane %v1772_v13, %v1182_v38 }
 0x31c   :  { %v1185_v63 = vsel %vm1184_vm15, %v1183_v62, %v1181_v56 }
 0x31d   :  { %v1114_v25 = vpop.permute.xlu2 %1113 }
 0x31e   :  { %v1197_v44 = vperm.slane %v1114_v25, %v1737_v36 }
 0x326   :  { %v1111_v18 = vpop.permute.xlu0 %1110 }
 0x327   :  { %v1195_v46 = vperm.slane %v1111_v18, %v1740_v27 }
 0x329   :  { %v1196_v47 = vsel %vm1140_vm4, %v1195_v46, %v1194_v43 }
 0x32a   :  { %v1198_v27 = vsel %vm1144_vm5, %v1197_v44, %v1196_v47 }
 0x344   :  { %v1117_v39 = vpop.permute.xlu1 %1116 }
 0x345   :  { %v1199_v49 = vperm.slane %v1117_v39, %v1743_v30 }
 0x347   :  { %v1200_v58 = vsel %vm1148_vm6, %v1199_v49, %v1198_v27 }
 0x34a   :  { %v1123_v45 = vpop.permute.xlu2 %1122 }
 0x34b   :  { %v1203_v36 = vperm.slane %v1123_v45, %v1755_v12 }
 0x353   :  { %v1120_v37 = vpop.permute.xlu0 %1119 }
 0x354   :  { %v1201_v51 = vperm.slane %v1120_v37, %v1758_v1 }
 0x356   :  { %v1202_v60 = vsel %vm1152_vm7, %v1201_v51, %v1200_v58 }
 0x357   :  { %v1204_v11 = vsel %vm1156_vm8, %v1203_v36, %v1202_v60 }
 0x35b   :  { %v1099_v53 = vpop.permute.xlu0 %1098 }
 0x35c   :  { %v1187_v1 = vperm.slane %v1099_v53, %v1186_v52 }
 0x35e   :  { %v1189_v2 = vsel %vm1188_vm0, %v1187_v1, %v1185_v63 }
 0x371   :  { %v1126_v30 = vpop.permute.xlu1 %1125 }
 0x372   :  { %v1205_v57 = vperm.slane %v1126_v30, %v1158_v17 }
 0x374   :  { %v1206_v12 = vsel %vm1160_vm9, %v1205_v57, %v1204_v11 }
 0x375   :  { %v1207_v0 = vrot.slane %v1206_v12, 7 }
 0x377   :  { %v1209_v3 = vsel %vm1208_vm1, %v1189_v2, %v1207_v0 }
 0x378   :  { %1215 = vst.msk [vmem:[#allocation3] sm:$0x3] %vm1213_vm2, %v1209_v3 }
 0x379   :  { %1226 = dma.vmem_to_hbm [thread:$0]  %s1222_s5, 32, %s1224_s28, [#allocation4]  }
 0x37a   :  { %1333 = dma.done.wait [#allocation4], 32  }
 0x37b   :  { %1334 = vsyncadd [#allocation4], 4294967264 }
 0x37c   :  { %1231 = vsyncpa [#allocation4], 1 }

</bundles_post_ra>
